<compile_context>
chip_gen: v5e
topology: v5e:2x2
jax: 0.10.0
libtpu: 0.0.40
codegen_flags: <defaults>
</compile_context>

<pallas_src>
import jax
import jax.numpy as jnp
import numpy as np
from jax.experimental import pallas as pl
from jax.experimental.pallas import tpu as pltpu

EPS = 1e-5


def dec_kernel(x_ref, w_ref, o_ref, xc_ref):
    """One batch element per grid step.

    x_ref : (1, H, W, Cin)        bf16 NHWC input block (unpadded)
    w_ref : (8, 2*Cin, Cout)      bf16 packed ConvT weight; block k=(r*2+s)*2+dh
                                  row dw*Cin+ic = W_t[ic, oc, 3-r-2dh, 3-s-2dw]
    o_ref : (1, H, 2, W, 2*Cout)  [0, m, r, n, s*Cout+oc] = y[2m+r, 2n+s, oc];
                                  reshaping to (2H, 2W, Cout) is a free merge
    xc_ref: (H+2, W+1, 2*Cin)     bf16 scratch, column-paired padded input:
                                  xc[h, j, dw*Cin+ic] = x_pad[h, j+dw, ic]
    """
    H, W, Cin = x_ref.shape[1], x_ref.shape[2], x_ref.shape[3]
    Cout = w_ref.shape[2]
    HW = H * W

    x = x_ref[0]                                            # (H, W, Cin) bf16

    # ---- column-paired padded input (halo-only zeroing, interior rewritten)
    xc_ref[0:1, :, :] = jnp.zeros((1, W + 1, 2 * Cin), jnp.bfloat16)
    xc_ref[H + 1:H + 2, :, :] = jnp.zeros((1, W + 1, 2 * Cin), jnp.bfloat16)
    xc_ref[1:H + 1, 0:1, 0:Cin] = jnp.zeros((H, 1, Cin), jnp.bfloat16)
    xc_ref[1:H + 1, W:W + 1, Cin:2 * Cin] = jnp.zeros((H, 1, Cin), jnp.bfloat16)
    xc_ref[1:H + 1, 1:W + 1, 0:Cin] = x                     # dw = 0 half
    xc_ref[1:H + 1, 0:W, Cin:2 * Cin] = x                   # dw = 1 half

    # ---- ConvTranspose2d(k=4, s=2, p=1): 2 matmuls (K=2*Cin) per parity ----
    inv_count = 1.0 / (4.0 * HW)
    ch_sum = jnp.zeros((1, Cout), jnp.float32)
    ch_sq = jnp.zeros((1, Cout), jnp.float32)

    for s in range(2):
        # Row-shifted views a = 0, 1, 2 of the column-paired input; output
        # parity row r consumes views {r, r+1}.
        lhs = [xc_ref[a:a + H, s:s + W, :].reshape(HW, 2 * Cin) for a in range(3)]
        for r in range(2):
            k = (r * 2 + s) * 2
            y = (jnp.dot(lhs[r], w_ref[k], preferred_element_type=jnp.float32)
                 + jnp.dot(lhs[r + 1], w_ref[k + 1],
                           preferred_element_type=jnp.float32))    # (HW, Cout) f32
            # On-the-fly per-channel statistics (f32, before any rounding).
            ch_sum = ch_sum + jnp.sum(y, axis=0, keepdims=True)
            ch_sq = ch_sq + jnp.sum(y * y, axis=0, keepdims=True)
            o_ref[0:1, :, r:r + 1, :, s * Cout:(s + 1) * Cout] = (
                y.reshape(1, H, 1, W, Cout).astype(o_ref.dtype))

    # ---- InstanceNorm2d (affine=False) + ReLU fused, in place, no diff -----
    mean = ch_sum * inv_count                               # (1, Cout)
    var = jnp.maximum(ch_sq * inv_count - mean * mean, 0.0)
    inv_std = jax.lax.rsqrt(var + EPS)
    mean2 = jnp.concatenate([mean, mean], axis=1).reshape(1, 1, 1, 1, 2 * Cout)
    inv2 = jnp.concatenate([inv_std, inv_std], axis=1).reshape(1, 1, 1, 1, 2 * Cout)
    yall = o_ref[...].astype(jnp.float32)
    o_ref[...] = jnp.maximum((yall - mean2) * inv2, 0.0).astype(o_ref.dtype)


def _pack_weight(w):
    """PyTorch ConvTranspose2d weight (Cin, Cout, 4, 4) -> (8, 2*Cin, Cout).

    Block k = (r*2 + s)*2 + dh pairs with the padded-input window rows
    [r+dh : r+dh+H], cols [s : s+W] (column-paired over dw); its row
    dw*Cin + ic holds tap W[ic, oc, 3-r-2dh, 3-s-2dw].  All 16 taps are real
    (no zero blocks).
    """
    Cin, Cout = w.shape[0], w.shape[1]
    blocks = []
    for r in range(2):
        for s in range(2):
            for dh in range(2):
                taps = []
                for dw in range(2):
                    kh = 3 - r - 2 * dh
                    kw = 3 - s - 2 * dw
                    taps.append(w[:, :, kh, kw])                  # (Cin, Cout)
                blocks.append(jnp.concatenate(taps, axis=0))      # (2*Cin, Cout)
    return jnp.stack(blocks, axis=0)                              # (8, 2*Cin, Cout)


def _vmem_limit_bytes():
    limit = 64 * 1024 * 1024                     # safe default (fits all gens)
    try:
        cap = getattr(pltpu.get_tpu_info(), "vmem_capacity_bytes", None)
        if cap:                                  # ~48 MiB on v7x, 96 MiB on v5e/v6e
            limit = min(int(cap) * 3 // 4, 96 * 1024 * 1024)
    except Exception:
        pass
    return limit


def dec_forward_nhwc(x_nhwc, w, skip_nhwc, out_dtype=jnp.float32):
    """Channels-last dec.forward: x (N,H,W,Cin), skip (N,2H,2W,Cout) -> (N,2H,2W,2*Cout)."""
    N, H, W, Cin = x_nhwc.shape
    Cout = w.shape[1]

    # bf16 MXU inputs; accumulation / stats / normalization stay f32.
    xb = x_nhwc.astype(jnp.bfloat16)
    wp = _pack_weight(w.astype(jnp.float32)).astype(jnp.bfloat16)

    out_itemsize = jnp.dtype(out_dtype).itemsize
    flops = (2 * N * (H * W) * (2 * Cin) * Cout * 8        # 16 true conv taps
             + 8 * N * (H * W) * 4 * Cout)                  # norm + relu
    bytes_accessed = (N * H * W * Cin * 2                   # bf16 input
                      + 8 * 2 * Cin * Cout * 2              # bf16 packed weight
                      + N * H * W * 4 * Cout * out_itemsize)

    out = pl.pallas_call(
        dec_kernel,
        out_shape=jax.ShapeDtypeStruct((N, H, 2, W, 2 * Cout), out_dtype),
        grid_spec=pltpu.PrefetchScalarGridSpec(
            num_scalar_prefetch=0,
            grid=(N,),
            in_specs=[
                pl.BlockSpec((1, H, W, Cin), lambda n: (n, 0, 0, 0)),
                # Grid-invariant weight block (constant index_map -> fetched once).
                pl.BlockSpec((8, 2 * Cin, Cout), lambda n: (0, 0, 0)),
            ],
            out_specs=pl.BlockSpec((1, H, 2, W, 2 * Cout),
                                   lambda n: (n, 0, 0, 0, 0)),
            scratch_shapes=[pltpu.VMEM((H + 2, W + 1, 2 * Cin), jnp.bfloat16)],
        ),
        compiler_params=pltpu.CompilerParams(
            dimension_semantics=("parallel",),
            vmem_limit_bytes=_vmem_limit_bytes(),
        ),
        cost_estimate=pl.CostEstimate(
            flops=flops, transcendentals=N * Cout, bytes_accessed=bytes_accessed),
    )(xb, wp)

    # (N, H, 2, W, 2*Cout) -> NHWC (N, 2H, 2W, Cout): contiguous merge, no copy.
    y = out.reshape(N, 2 * H, 2 * W, Cout)
    return jnp.concatenate([y, skip_nhwc.astype(out_dtype)], axis=-1)


@jax.jit
def dec_forward(x_nchw, w, skip_nchw):
    """NCHW compatibility wrapper (PyTorch parity); prefer dec_forward_nhwc
    inside a channels-last decoder to avoid the edge transposes."""
    x_nhwc = jnp.transpose(x_nchw, (0, 2, 3, 1))
    skip_nhwc = jnp.transpose(skip_nchw, (0, 2, 3, 1))
    out_nhwc = dec_forward_nhwc(x_nhwc, w, skip_nhwc, out_dtype=jnp.float32)
    return jnp.transpose(out_nhwc, (0, 3, 1, 2))


def ref_forward(x_nchw, w, skip_nchw):
    """Pure-JAX f32 reference matching PyTorch semantics (for validation)."""
    w_flip = w[:, :, ::-1, ::-1]                     # (Cin, Cout, 4, 4)
    w_conv = jnp.transpose(w_flip, (1, 0, 2, 3))     # (Cout, Cin, 4, 4)
    y = jax.lax.conv_general_dilated(
        x_nchw, w_conv, window_strides=(1, 1),
        padding=((2, 2), (2, 2)), lhs_dilation=(2, 2),
        dimension_numbers=("NCHW", "OIHW", "NCHW"))
    mean = y.mean(axis=(2, 3), keepdims=True)
    var = ((y - mean) ** 2).mean(axis=(2, 3), keepdims=True)
    y = (y - mean) / jnp.sqrt(var + EPS)
    y = jnp.maximum(y, 0.0)
    return jnp.concatenate([y, skip_nchw], axis=1)


if __name__ == "__main__":
    N, Cin, Cout, H, W = 2, 4, 8, 8, 8   # output spatial is (2H, 2W) = (16, 16)

    key = jax.random.PRNGKey(0)
    k1, k2, k3 = jax.random.split(key, 3)
    x = jax.random.normal(k1, (N, Cin, H, W), jnp.float32)
    skip = jax.random.normal(k2, (N, Cout, 2 * H, 2 * W), jnp.float32)
    w = 0.1 * jax.random.normal(k3, (Cin, Cout, 4, 4), jnp.float32)

    # The kernel feeds the MXU in bf16, so validate both paths from the same
    # bf16-quantized inputs; this isolates kernel math (accumulation order,
    # norm, layout) from input quantization and keeps the 1e-3 tolerance
    # meaningful.  (Vs. a true f32 PyTorch ConvT, error grows with Cin.)
    xq = x.astype(jnp.bfloat16).astype(jnp.float32)
    wq = w.astype(jnp.bfloat16).astype(jnp.float32)

    out = dec_forward(xq, wq, skip)
    jax.block_until_ready(out)

    ref = ref_forward(xq, wq, skip)
    np.testing.assert_allclose(np.asarray(out), np.asarray(ref),
                               rtol=1e-3, atol=1e-3)
    assert out.shape == (N, 2 * Cout, 2 * H, 2 * W)

    print("KERNEL_OK")
</pallas_src>

<mosaic_0001>
module attributes {stable_mosaic.version = 11 : i64} {
  func.func @dec_kernel(%arg0: i32, %arg1: memref<1x8x8x4xbf16, #tpu.memory_space<vmem>>, %arg2: memref<8x8x8xbf16, #tpu.memory_space<vmem>>, %arg3: memref<1x8x2x8x16xf32, #tpu.memory_space<vmem>>, %arg4: memref<10x9x8xbf16, #tpu.memory_space<vmem>>) attributes {dimension_semantics = [#tpu.dimension_semantics<parallel>], iteration_bounds = array<i64: 2>, scalar_prefetch = 0 : i64, scratch_operands = 1 : i64, tpu.core_type = #tpu.core_type<tc>, window_params = [{transform_indices = @transform_0, window_bounds = array<i64: 1, 8, 8, 4>}, {pipeline_mode = #tpu.pipeline_mode<synchronous>, transform_indices = @transform_1, window_bounds = array<i64: 8, 8, 8>}, {transform_indices = @transform_2, window_bounds = array<i64: 1, 8, 2, 8, 16>}]} {
    %c0 = arith.constant 0 : index
    %c0_0 = arith.constant 0 : index
    %c0_1 = arith.constant 0 : index
    %c0_2 = arith.constant 0 : index
    %0 = vector.load %arg1[%c0, %c0_0, %c0_1, %c0_2] : memref<1x8x8x4xbf16, #tpu.memory_space<vmem>>, vector<1x8x8x4xbf16>
    %1 = vector.shape_cast %0 : vector<1x8x8x4xbf16> to vector<8x8x4xbf16>
    %cst = arith.constant 0.000000e+00 : bf16
    %2 = vector.broadcast %cst : bf16 to vector<1x9x8xbf16>
    %c0_3 = arith.constant 0 : index
    %c0_4 = arith.constant 0 : index
    %c0_5 = arith.constant 0 : index
    %3 = vector.load %arg4[%c0_3, %c0_4, %c0_5] : memref<10x9x8xbf16, #tpu.memory_space<vmem>>, vector<1x9x8xbf16>
    tpu.vector_store %arg4[%c0_3, %c0_4, %c0_5], %2 {strides = array<i32>} : memref<10x9x8xbf16, #tpu.memory_space<vmem>>, vector<1x9x8xbf16>,
    %cst_6 = arith.constant 0.000000e+00 : bf16
    %4 = vector.broadcast %cst_6 : bf16 to vector<1x9x8xbf16>
    %c9 = arith.constant 9 : index
    %c0_7 = arith.constant 0 : index
    %c0_8 = arith.constant 0 : index
    %5 = vector.load %arg4[%c9, %c0_7, %c0_8] : memref<10x9x8xbf16, #tpu.memory_space<vmem>>, vector<1x9x8xbf16>
    tpu.vector_store %arg4[%c9, %c0_7, %c0_8], %4 {strides = array<i32>} : memref<10x9x8xbf16, #tpu.memory_space<vmem>>, vector<1x9x8xbf16>,
    %cst_9 = arith.constant 0.000000e+00 : bf16
    %6 = vector.broadcast %cst_9 : bf16 to vector<8x1x4xbf16>
    %c1 = arith.constant 1 : index
    %c0_10 = arith.constant 0 : index
    %c0_11 = arith.constant 0 : index
    %7 = vector.load %arg4[%c1, %c0_10, %c0_11] : memref<10x9x8xbf16, #tpu.memory_space<vmem>>, vector<8x1x4xbf16>
    tpu.vector_store %arg4[%c1, %c0_10, %c0_11], %6 {strides = array<i32>} : memref<10x9x8xbf16, #tpu.memory_space<vmem>>, vector<8x1x4xbf16>,
    %cst_12 = arith.constant 0.000000e+00 : bf16
    %8 = vector.broadcast %cst_12 : bf16 to vector<8x1x4xbf16>
    %c1_13 = arith.constant 1 : index
    %c8 = arith.constant 8 : index
    %c4 = arith.constant 4 : index
    %9 = vector.load %arg4[%c1_13, %c8, %c4] : memref<10x9x8xbf16, #tpu.memory_space<vmem>>, vector<8x1x4xbf16>
    tpu.vector_store %arg4[%c1_13, %c8, %c4], %8 {strides = array<i32>} : memref<10x9x8xbf16, #tpu.memory_space<vmem>>, vector<8x1x4xbf16>,
    %c1_14 = arith.constant 1 : index
    %c1_15 = arith.constant 1 : index
    %c0_16 = arith.constant 0 : index
    %10 = vector.load %arg4[%c1_14, %c1_15, %c0_16] : memref<10x9x8xbf16, #tpu.memory_space<vmem>>, vector<8x8x4xbf16>
    tpu.vector_store %arg4[%c1_14, %c1_15, %c0_16], %1 {strides = array<i32>} : memref<10x9x8xbf16, #tpu.memory_space<vmem>>, vector<8x8x4xbf16>,
    %c1_17 = arith.constant 1 : index
    %c0_18 = arith.constant 0 : index
    %c4_19 = arith.constant 4 : index
    %11 = vector.load %arg4[%c1_17, %c0_18, %c4_19] : memref<10x9x8xbf16, #tpu.memory_space<vmem>>, vector<8x8x4xbf16>
    tpu.vector_store %arg4[%c1_17, %c0_18, %c4_19], %1 {strides = array<i32>} : memref<10x9x8xbf16, #tpu.memory_space<vmem>>, vector<8x8x4xbf16>,
    %cst_20 = arith.constant 0.000000e+00 : f32
    %12 = vector.broadcast %cst_20 : f32 to vector<1x8xf32>
    %cst_21 = arith.constant 0.000000e+00 : f32
    %13 = vector.broadcast %cst_21 : f32 to vector<1x8xf32>
    %c0_22 = arith.constant 0 : index
    %c0_23 = arith.constant 0 : index
    %c0_24 = arith.constant 0 : index
    %14 = vector.load %arg4[%c0_22, %c0_23, %c0_24] : memref<10x9x8xbf16, #tpu.memory_space<vmem>>, vector<8x8x8xbf16>
    %15 = vector.shape_cast %14 : vector<8x8x8xbf16> to vector<64x8xbf16>
    %c1_25 = arith.constant 1 : index
    %c0_26 = arith.constant 0 : index
    %c0_27 = arith.constant 0 : index
    %16 = vector.load %arg4[%c1_25, %c0_26, %c0_27] : memref<10x9x8xbf16, #tpu.memory_space<vmem>>, vector<8x8x8xbf16>
    %17 = vector.shape_cast %16 : vector<8x8x8xbf16> to vector<64x8xbf16>
    %c2 = arith.constant 2 : index
    %c0_28 = arith.constant 0 : index
    %c0_29 = arith.constant 0 : index
    %18 = vector.load %arg4[%c2, %c0_28, %c0_29] : memref<10x9x8xbf16, #tpu.memory_space<vmem>>, vector<8x8x8xbf16>
    %19 = vector.shape_cast %18 : vector<8x8x8xbf16> to vector<64x8xbf16>
    %c0_30 = arith.constant 0 : index
    %c0_31 = arith.constant 0 : index
    %c0_32 = arith.constant 0 : index
    %20 = vector.load %arg2[%c0_30, %c0_31, %c0_32] : memref<8x8x8xbf16, #tpu.memory_space<vmem>>, vector<1x8x8xbf16>
    %21 = vector.shape_cast %20 : vector<1x8x8xbf16> to vector<8x8xbf16>
    %cst_33 = arith.constant dense<0.000000e+00> : vector<64x8xf32>
    %22 = tpu.matmul %15, %21, %cst_33 {dimension_numbers = #tpu.dot_dimension_numbers<[1], [0], [0], [1], [0, 0, 1, 1], [], []>} : vector<64x8xbf16>, vector<8x8xbf16>, vector<64x8xf32> -> vector<64x8xf32>
    %c1_34 = arith.constant 1 : index
    %c0_35 = arith.constant 0 : index
    %c0_36 = arith.constant 0 : index
    %23 = vector.load %arg2[%c1_34, %c0_35, %c0_36] : memref<8x8x8xbf16, #tpu.memory_space<vmem>>, vector<1x8x8xbf16>
    %24 = vector.shape_cast %23 : vector<1x8x8xbf16> to vector<8x8xbf16>
    %cst_37 = arith.constant dense<0.000000e+00> : vector<64x8xf32>
    %25 = tpu.matmul %17, %24, %cst_37 {dimension_numbers = #tpu.dot_dimension_numbers<[1], [0], [0], [1], [0, 0, 1, 1], [], []>} : vector<64x8xbf16>, vector<8x8xbf16>, vector<64x8xf32> -> vector<64x8xf32>
    %26 = arith.addf %22, %25 : vector<64x8xf32>
    %cst_38 = arith.constant dense<0.000000e+00> : vector<8xf32>
    %27 = vector.multi_reduction <add>, %26, %cst_38 [0] : vector<64x8xf32> to vector<8xf32>
    %28 = vector.shape_cast %27 : vector<8xf32> to vector<1x8xf32>
    %29 = arith.addf %12, %28 : vector<1x8xf32>
    %30 = arith.mulf %26, %26 : vector<64x8xf32>
    %cst_39 = arith.constant dense<0.000000e+00> : vector<8xf32>
    %31 = vector.multi_reduction <add>, %30, %cst_39 [0] : vector<64x8xf32> to vector<8xf32>
    %32 = vector.shape_cast %31 : vector<8xf32> to vector<1x8xf32>
    %33 = arith.addf %13, %32 : vector<1x8xf32>
    %34 = vector.shape_cast %26 : vector<64x8xf32> to vector<1x8x1x8x8xf32>
    %c0_40 = arith.constant 0 : index
    %c0_41 = arith.constant 0 : index
    %c0_42 = arith.constant 0 : index
    %c0_43 = arith.constant 0 : index
    %c0_44 = arith.constant 0 : index
    %35 = vector.load %arg3[%c0_40, %c0_41, %c0_42, %c0_43, %c0_44] : memref<1x8x2x8x16xf32, #tpu.memory_space<vmem>>, vector<1x8x1x8x8xf32>
    tpu.vector_store %arg3[%c0_40, %c0_41, %c0_42, %c0_43, %c0_44], %34 {strides = array<i32>} : memref<1x8x2x8x16xf32, #tpu.memory_space<vmem>>, vector<1x8x1x8x8xf32>,
    %c4_45 = arith.constant 4 : index
    %c0_46 = arith.constant 0 : index
    %c0_47 = arith.constant 0 : index
    %36 = vector.load %arg2[%c4_45, %c0_46, %c0_47] : memref<8x8x8xbf16, #tpu.memory_space<vmem>>, vector<1x8x8xbf16>
    %37 = vector.shape_cast %36 : vector<1x8x8xbf16> to vector<8x8xbf16>
    %cst_48 = arith.constant dense<0.000000e+00> : vector<64x8xf32>
    %38 = tpu.matmul %17, %37, %cst_48 {dimension_numbers = #tpu.dot_dimension_numbers<[1], [0], [0], [1], [0, 0, 1, 1], [], []>} : vector<64x8xbf16>, vector<8x8xbf16>, vector<64x8xf32> -> vector<64x8xf32>
    %c5 = arith.constant 5 : index
    %c0_49 = arith.constant 0 : index
    %c0_50 = arith.constant 0 : index
    %39 = vector.load %arg2[%c5, %c0_49, %c0_50] : memref<8x8x8xbf16, #tpu.memory_space<vmem>>, vector<1x8x8xbf16>
    %40 = vector.shape_cast %39 : vector<1x8x8xbf16> to vector<8x8xbf16>
    %cst_51 = arith.constant dense<0.000000e+00> : vector<64x8xf32>
    %41 = tpu.matmul %19, %40, %cst_51 {dimension_numbers = #tpu.dot_dimension_numbers<[1], [0], [0], [1], [0, 0, 1, 1], [], []>} : vector<64x8xbf16>, vector<8x8xbf16>, vector<64x8xf32> -> vector<64x8xf32>
    %42 = arith.addf %38, %41 : vector<64x8xf32>
    %cst_52 = arith.constant dense<0.000000e+00> : vector<8xf32>
    %43 = vector.multi_reduction <add>, %42, %cst_52 [0] : vector<64x8xf32> to vector<8xf32>
    %44 = vector.shape_cast %43 : vector<8xf32> to vector<1x8xf32>
    %45 = arith.addf %29, %44 : vector<1x8xf32>
    %46 = arith.mulf %42, %42 : vector<64x8xf32>
    %cst_53 = arith.constant dense<0.000000e+00> : vector<8xf32>
    %47 = vector.multi_reduction <add>, %46, %cst_53 [0] : vector<64x8xf32> to vector<8xf32>
    %48 = vector.shape_cast %47 : vector<8xf32> to vector<1x8xf32>
    %49 = arith.addf %33, %48 : vector<1x8xf32>
    %50 = vector.shape_cast %42 : vector<64x8xf32> to vector<1x8x1x8x8xf32>
    %c0_54 = arith.constant 0 : index
    %c0_55 = arith.constant 0 : index
    %c1_56 = arith.constant 1 : index
    %c0_57 = arith.constant 0 : index
    %c0_58 = arith.constant 0 : index
    %51 = vector.load %arg3[%c0_54, %c0_55, %c1_56, %c0_57, %c0_58] : memref<1x8x2x8x16xf32, #tpu.memory_space<vmem>>, vector<1x8x1x8x8xf32>
    tpu.vector_store %arg3[%c0_54, %c0_55, %c1_56, %c0_57, %c0_58], %50 {strides = array<i32>} : memref<1x8x2x8x16xf32, #tpu.memory_space<vmem>>, vector<1x8x1x8x8xf32>,
    %c0_59 = arith.constant 0 : index
    %c1_60 = arith.constant 1 : index
    %c0_61 = arith.constant 0 : index
    %52 = vector.load %arg4[%c0_59, %c1_60, %c0_61] : memref<10x9x8xbf16, #tpu.memory_space<vmem>>, vector<8x8x8xbf16>
    %53 = vector.shape_cast %52 : vector<8x8x8xbf16> to vector<64x8xbf16>
    %c1_62 = arith.constant 1 : index
    %c1_63 = arith.constant 1 : index
    %c0_64 = arith.constant 0 : index
    %54 = vector.load %arg4[%c1_62, %c1_63, %c0_64] : memref<10x9x8xbf16, #tpu.memory_space<vmem>>, vector<8x8x8xbf16>
    %55 = vector.shape_cast %54 : vector<8x8x8xbf16> to vector<64x8xbf16>
    %c2_65 = arith.constant 2 : index
    %c1_66 = arith.constant 1 : index
    %c0_67 = arith.constant 0 : index
    %56 = vector.load %arg4[%c2_65, %c1_66, %c0_67] : memref<10x9x8xbf16, #tpu.memory_space<vmem>>, vector<8x8x8xbf16>
    %57 = vector.shape_cast %56 : vector<8x8x8xbf16> to vector<64x8xbf16>
    %c2_68 = arith.constant 2 : index
    %c0_69 = arith.constant 0 : index
    %c0_70 = arith.constant 0 : index
    %58 = vector.load %arg2[%c2_68, %c0_69, %c0_70] : memref<8x8x8xbf16, #tpu.memory_space<vmem>>, vector<1x8x8xbf16>
    %59 = vector.shape_cast %58 : vector<1x8x8xbf16> to vector<8x8xbf16>
    %cst_71 = arith.constant dense<0.000000e+00> : vector<64x8xf32>
    %60 = tpu.matmul %53, %59, %cst_71 {dimension_numbers = #tpu.dot_dimension_numbers<[1], [0], [0], [1], [0, 0, 1, 1], [], []>} : vector<64x8xbf16>, vector<8x8xbf16>, vector<64x8xf32> -> vector<64x8xf32>
    %c3 = arith.constant 3 : index
    %c0_72 = arith.constant 0 : index
    %c0_73 = arith.constant 0 : index
    %61 = vector.load %arg2[%c3, %c0_72, %c0_73] : memref<8x8x8xbf16, #tpu.memory_space<vmem>>, vector<1x8x8xbf16>
    %62 = vector.shape_cast %61 : vector<1x8x8xbf16> to vector<8x8xbf16>
    %cst_74 = arith.constant dense<0.000000e+00> : vector<64x8xf32>
    %63 = tpu.matmul %55, %62, %cst_74 {dimension_numbers = #tpu.dot_dimension_numbers<[1], [0], [0], [1], [0, 0, 1, 1], [], []>} : vector<64x8xbf16>, vector<8x8xbf16>, vector<64x8xf32> -> vector<64x8xf32>
    %64 = arith.addf %60, %63 : vector<64x8xf32>
    %cst_75 = arith.constant dense<0.000000e+00> : vector<8xf32>
    %65 = vector.multi_reduction <add>, %64, %cst_75 [0] : vector<64x8xf32> to vector<8xf32>
    %66 = vector.shape_cast %65 : vector<8xf32> to vector<1x8xf32>
    %67 = arith.addf %45, %66 : vector<1x8xf32>
    %68 = arith.mulf %64, %64 : vector<64x8xf32>
    %cst_76 = arith.constant dense<0.000000e+00> : vector<8xf32>
    %69 = vector.multi_reduction <add>, %68, %cst_76 [0] : vector<64x8xf32> to vector<8xf32>
    %70 = vector.shape_cast %69 : vector<8xf32> to vector<1x8xf32>
    %71 = arith.addf %49, %70 : vector<1x8xf32>
    %72 = vector.shape_cast %64 : vector<64x8xf32> to vector<1x8x1x8x8xf32>
    %c0_77 = arith.constant 0 : index
    %c0_78 = arith.constant 0 : index
    %c0_79 = arith.constant 0 : index
    %c0_80 = arith.constant 0 : index
    %c8_81 = arith.constant 8 : index
    %73 = vector.load %arg3[%c0_77, %c0_78, %c0_79, %c0_80, %c8_81] : memref<1x8x2x8x16xf32, #tpu.memory_space<vmem>>, vector<1x8x1x8x8xf32>
    tpu.vector_store %arg3[%c0_77, %c0_78, %c0_79, %c0_80, %c8_81], %72 {strides = array<i32>} : memref<1x8x2x8x16xf32, #tpu.memory_space<vmem>>, vector<1x8x1x8x8xf32>,
    %c6 = arith.constant 6 : index
    %c0_82 = arith.constant 0 : index
    %c0_83 = arith.constant 0 : index
    %74 = vector.load %arg2[%c6, %c0_82, %c0_83] : memref<8x8x8xbf16, #tpu.memory_space<vmem>>, vector<1x8x8xbf16>
    %75 = vector.shape_cast %74 : vector<1x8x8xbf16> to vector<8x8xbf16>
    %cst_84 = arith.constant dense<0.000000e+00> : vector<64x8xf32>
    %76 = tpu.matmul %55, %75, %cst_84 {dimension_numbers = #tpu.dot_dimension_numbers<[1], [0], [0], [1], [0, 0, 1, 1], [], []>} : vector<64x8xbf16>, vector<8x8xbf16>, vector<64x8xf32> -> vector<64x8xf32>
    %c7 = arith.constant 7 : index
    %c0_85 = arith.constant 0 : index
    %c0_86 = arith.constant 0 : index
    %77 = vector.load %arg2[%c7, %c0_85, %c0_86] : memref<8x8x8xbf16, #tpu.memory_space<vmem>>, vector<1x8x8xbf16>
    %78 = vector.shape_cast %77 : vector<1x8x8xbf16> to vector<8x8xbf16>
    %cst_87 = arith.constant dense<0.000000e+00> : vector<64x8xf32>
    %79 = tpu.matmul %57, %78, %cst_87 {dimension_numbers = #tpu.dot_dimension_numbers<[1], [0], [0], [1], [0, 0, 1, 1], [], []>} : vector<64x8xbf16>, vector<8x8xbf16>, vector<64x8xf32> -> vector<64x8xf32>
    %80 = arith.addf %76, %79 : vector<64x8xf32>
    %cst_88 = arith.constant dense<0.000000e+00> : vector<8xf32>
    %81 = vector.multi_reduction <add>, %80, %cst_88 [0] : vector<64x8xf32> to vector<8xf32>
    %82 = vector.shape_cast %81 : vector<8xf32> to vector<1x8xf32>
    %83 = arith.addf %67, %82 : vector<1x8xf32>
    %84 = arith.mulf %80, %80 : vector<64x8xf32>
    %cst_89 = arith.constant dense<0.000000e+00> : vector<8xf32>
    %85 = vector.multi_reduction <add>, %84, %cst_89 [0] : vector<64x8xf32> to vector<8xf32>
    %86 = vector.shape_cast %85 : vector<8xf32> to vector<1x8xf32>
    %87 = arith.addf %71, %86 : vector<1x8xf32>
    %88 = vector.shape_cast %80 : vector<64x8xf32> to vector<1x8x1x8x8xf32>
    %c0_90 = arith.constant 0 : index
    %c0_91 = arith.constant 0 : index
    %c1_92 = arith.constant 1 : index
    %c0_93 = arith.constant 0 : index
    %c8_94 = arith.constant 8 : index
    %89 = vector.load %arg3[%c0_90, %c0_91, %c1_92, %c0_93, %c8_94] : memref<1x8x2x8x16xf32, #tpu.memory_space<vmem>>, vector<1x8x1x8x8xf32>
    tpu.vector_store %arg3[%c0_90, %c0_91, %c1_92, %c0_93, %c8_94], %88 {strides = array<i32>} : memref<1x8x2x8x16xf32, #tpu.memory_space<vmem>>, vector<1x8x1x8x8xf32>,
    %cst_95 = arith.constant 3.906250e-03 : f32
    %90 = vector.broadcast %cst_95 : f32 to vector<1x8xf32>
    %91 = arith.mulf %83, %90 : vector<1x8xf32>
    %cst_96 = arith.constant 3.906250e-03 : f32
    %92 = vector.broadcast %cst_96 : f32 to vector<1x8xf32>
    %93 = arith.mulf %87, %92 : vector<1x8xf32>
    %94 = arith.mulf %91, %91 : vector<1x8xf32>
    %95 = arith.subf %93, %94 : vector<1x8xf32>
    %cst_97 = arith.constant 0.000000e+00 : f32
    %96 = vector.broadcast %cst_97 : f32 to vector<1x8xf32>
    %97 = arith.maximumf %95, %96 : vector<1x8xf32>
    %cst_98 = arith.constant 9.99999974E-6 : f32
    %98 = vector.broadcast %cst_98 : f32 to vector<1x8xf32>
    %99 = arith.addf %97, %98 : vector<1x8xf32>
    %100 = math.rsqrt %99 : vector<1x8xf32>
    %101 = tpu.concatenate %91, %91 in 1 : vector<1x8xf32>, vector<1x8xf32> -> vector<1x16xf32>
    %102 = vector.shape_cast %101 : vector<1x16xf32> to vector<1x1x1x1x16xf32>
    %103 = tpu.concatenate %100, %100 in 1 : vector<1x8xf32>, vector<1x8xf32> -> vector<1x16xf32>
    %104 = vector.shape_cast %103 : vector<1x16xf32> to vector<1x1x1x1x16xf32>
    %c0_99 = arith.constant 0 : index
    %c0_100 = arith.constant 0 : index
    %c0_101 = arith.constant 0 : index
    %c0_102 = arith.constant 0 : index
    %c0_103 = arith.constant 0 : index
    %105 = vector.load %arg3[%c0_99, %c0_100, %c0_101, %c0_102, %c0_103] : memref<1x8x2x8x16xf32, #tpu.memory_space<vmem>>, vector<1x8x2x8x16xf32>
    %106 = vector.broadcast %102 : vector<1x1x1x1x16xf32> to vector<1x8x2x8x16xf32>
    %107 = arith.subf %105, %106 : vector<1x8x2x8x16xf32>
    %108 = vector.broadcast %104 : vector<1x1x1x1x16xf32> to vector<1x8x2x8x16xf32>
    %109 = arith.mulf %107, %108 : vector<1x8x2x8x16xf32>
    %cst_104 = arith.constant 0.000000e+00 : f32
    %110 = vector.broadcast %cst_104 : f32 to vector<1x8x2x8x16xf32>
    %111 = arith.maximumf %109, %110 : vector<1x8x2x8x16xf32>
    %c0_105 = arith.constant 0 : index
    %c0_106 = arith.constant 0 : index
    %c0_107 = arith.constant 0 : index
    %c0_108 = arith.constant 0 : index
    %c0_109 = arith.constant 0 : index
    %112 = vector.load %arg3[%c0_105, %c0_106, %c0_107, %c0_108, %c0_109] : memref<1x8x2x8x16xf32, #tpu.memory_space<vmem>>, vector<1x8x2x8x16xf32>
    tpu.vector_store %arg3[%c0_105, %c0_106, %c0_107, %c0_108, %c0_109], %111 {strides = array<i32>} : memref<1x8x2x8x16xf32, #tpu.memory_space<vmem>>, vector<1x8x2x8x16xf32>,
    return
  }
  func.func @transform_0(%arg0: i32) -> (i32, i32, i32, i32) {
    %c0_i32 = arith.constant 0 : i32
    %c0_i32_0 = arith.constant 0 : i32
    %c0_i32_1 = arith.constant 0 : i32
    %c0_i32_2 = arith.constant 0 : i32
    return %arg0, %c0_i32, %c0_i32_0, %c0_i32_1 : i32, i32, i32, i32
  }
  func.func @transform_1(%arg0: i32) -> (i32, i32, i32) {
    %c0_i32 = arith.constant 0 : i32
    %c0_i32_0 = arith.constant 0 : i32
    %c0_i32_1 = arith.constant 0 : i32
    %c0_i32_2 = arith.constant 0 : i32
    return %c0_i32, %c0_i32_0, %c0_i32_1 : i32, i32, i32
  }
  func.func @transform_2(%arg0: i32) -> (i32, i32, i32, i32, i32) {
    %c0_i32 = arith.constant 0 : i32
    %c0_i32_0 = arith.constant 0 : i32
    %c0_i32_1 = arith.constant 0 : i32
    %c0_i32_2 = arith.constant 0 : i32
    %c0_i32_3 = arith.constant 0 : i32
    return %arg0, %c0_i32, %c0_i32_0, %c0_i32_1, %c0_i32_2 : i32, i32, i32, i32, i32
  }
}

</mosaic_0001>

<bundles_post_ra>
// kernel: dec_forward.1
= control target key start
LH: loop header
LB: loop body
LE: loop exit
PB: predicated region body
PF: predicated region fallthrough
CT: control target
= control target key end

     0   :  { %s1881_s9 = smov 0   ;;  %s2379_s0 = inlined_call_operand.vmem [shape: bf16[2,8,8,4], index: 0, kind: input, shape index: {}]   ;;  %s2380_s1 = inlined_call_operand.vmem [shape: bf16[8,8,8], index: 1, kind: input, shape index: {}]   ;;  %s2381_s2 = inlined_call_operand.vmem [shape: f32[2,8,2,8,16], index: 2, kind: output, shape index: {}]  }
   0x1 LB: > { %s1714_s10 = sadd.s32 4294967295, %s1861_s9   ;;  %p1718_p0 = scmp.ge.s32.totalorder %s1861_s9, 1  ;;  %s1861_s9 = sphi %s1881_s9, %s12_s9  }
   0x2   : > { %p112_p1 = scmp.lt.s32.totalorder %s1861_s9, 3 }
   0x4   : > { %p113_p2 = pnand %p1718_p0, %p112_p1 }
   0x5   : > { %p134_p3 = scmp.lt.s32.totalorder (!%p113_p2), %s1714_s10, 1  ;;  %s1863_s15 = smov (!%p113_p2), 4  }
   0x6   : > { %116 = sbr.rel (%p113_p2) target bundleno = 589 (0x24d), region = 28  ;;  %s1865_s8 = smov (!%p113_p2), 8  }
   0xb   : > { %vm155_vm0 = vcmask 57344   ;;  %vm156_vm1 = vsmask.f32 256  ;;  %v158_v0 = vld [vmem:[#allocation2 + $0x4] sm:$0x1]  ;;  %vm167_vm3 = vcmask 24576  }
   0xc   : > { %vm157_vm2 = vmand %vm155_vm0, %vm156_vm1  ;;  %v163_v1 = vld [vmem:[#allocation2 + $0x4c] sm:$0x1]  ;;  %v175_v2 = vld [vmem:[#allocation2 + $0x18] sm:$0x1]  ;;  %vm193_vm4 = vcmask 57376   ;;  %s2391_s10 = smov (!%p134_p3, %s1714_s10), 1 }
   0xd   : > { %v159_v3 = vsel %vm157_vm2, 0, %v158_v0  ;;  %v164_v4 = vsel %vm157_vm2, 0, %v163_v1  ;;  %vm1891_vm5 = vmand %vm167_vm3, %vm156_vm1  ;;  %v201_v6 = vld [vmem:[#allocation2 + $0x1c] sm:$0x1]  ;;  %vm300_vm7 = vsmask.f32 7938 }
   0xe   : > { %160 = vst [vmem:[#allocation2 + $0x4] sm:$0x1] %v159_v3  ;;  %v176_v7 = vsel %vm1891_vm5, 0, %v175_v2  ;;  %vm1897_vm6 = vmand %vm193_vm4, %vm156_vm1  ;;  %s1828_s11 = sshll.u32 %s2391_s10, 5  ;;  %vm299_vm8 = vcmask 27648   ;;  %vm153_vm10 = vcmask 60416  }
   0xf   : > { %165 = vst [vmem:[#allocation2 + $0x4c] sm:$0x1] %v164_v4  ;;  %v202_v9 = vsel %vm1897_vm6, 0, %v201_v6  ;;  %s1907_s14 = scalar_lea.vmem %s2379_s0, %s1828_s11  ;;  %v169_v10 = vld [vmem:[#allocation2 + $0x8] sm:$0x1]  ;;  %vm1925_vm9 = vmand %vm299_vm8, %vm300_vm7  ;;  %vm452_vm11 = vcmask 1043456  }
  0x10   : > { %177 = vst [vmem:[#allocation2 + $0x18] sm:$0x1] %v176_v7  ;;  %v195_v11 = vld [vmem:[#allocation2 + $0xc] sm:$0x1]  ;;  %v147_v12 = vld [vmem:[%s1907_s14 + $0x8] sm:$0xf] }
  0x11   : > { %203 = vst [vmem:[#allocation2 + $0x1c] sm:$0x1] %v202_v9  ;;  %v145_v13 = vld [vmem:[%s1907_s14] sm:$0xf]  ;;  %362 = vrot.lane.b32.xlu1 %v147_v12, %s1863_s15  ;;  %v236_v14 = vshrl.u32 %v147_v12, 16  ;;  %v239_v15 = vshll.u32 %v147_v12, 16 }
  0x12   : > { %v170_v16 = vsel %vm1891_vm5, 0, %v169_v10  ;;  %v196_v17 = vsel %vm1897_vm6, 0, %v195_v11  ;;  %358 = vrot.lane.b32.xlu0 %v145_v13, %s1863_s15  ;;  %v148_v18 = vld [vmem:[%s1907_s14 + $0xc] sm:$0xf]  ;;  %v220_v19 = vshrl.u32 %v145_v13, 16  ;;  %v223_v20 = vshll.u32 %v145_v13, 16 }
  0x13   : > { %171 = vst [vmem:[#allocation2 + $0x8] sm:$0x1] %v170_v16  ;;  %v178_v21 = vld [vmem:[#allocation2 + $0x20] sm:$0x1]  ;;  %v238_v22 = vrot.slane %v236_v14, 7  ;;  %v244_v27 = vshrl.u32 %v148_v18, 16 }
  0x14   : > { %197 = vst [vmem:[#allocation2 + $0xc] sm:$0x1] %v196_v17  ;;  %v179_v23 = vsel %vm1891_vm5, 0, %v178_v21  ;;  %v204_v24 = vld [vmem:[#allocation2 + $0x24] sm:$0x1]  ;;  %v222_v25 = vrot.slane %v220_v19, 7 }
  0x15   : > { %180 = vst [vmem:[#allocation2 + $0x20] sm:$0x1] %v179_v23  ;;  %v205_v26 = vsel %vm1897_vm6, 0, %v204_v24  ;;  %v247_v28 = vshll.u32 %v148_v18, 16  ;;  %v241_v29 = vor.u32 %v239_v15, %v238_v22  ;;  %v242_v30 = vrot.slane %v238_v22, 4  ;;  %s1829_s4 = sshll.u32 %s2391_s10, 7 }
  0x16   : > { %206 = vst [vmem:[#allocation2 + $0x24] sm:$0x1] %v205_v26  ;;  %v146_v31 = vld [vmem:[%s1907_s14 + $0x4] sm:$0xf]  ;;  %v225_v34 = vor.u32 %v223_v20, %v222_v25  ;;  %v226_v35 = vrot.slane %v222_v25, 4  ;;  %v246_v36 = vrot.slane %v244_v27, 7  ;;  %s2130_s7 = scalar_lea.vmem %s2381_s2, %s1829_s4 }
  0x17   : > { %v314_v33 = vld [vmem:[#allocation2 + $0x18] sm:$0xf]  ;;  %v172_v37 = vld [vmem:[#allocation2 + $0x10] sm:$0x1]  ;;  %v198_v41 = vld [vmem:[#allocation2 + $0x14] sm:$0x1] }
  0x18   : > { %v317_v38 = vld [vmem:[#allocation2 + $0x1c] sm:$0x1]  ;;  %v315_v39 = vsel %vm1925_vm9, %v241_v29, %v314_v33  ;;  %v173_v40 = vsel %vm1891_vm5, 0, %v172_v37  ;;  %v228_v42 = vshrl.u32 %v146_v31, 16  ;;  %v249_v44 = vor.u32 %v247_v28, %v246_v36  ;;  %v149_v46 = vld [vmem:[%s1907_s14 + $0x10] sm:$0xf] }
  0x19   : > { %v318_v43 = vsel %vm1891_vm5, %v242_v30, %v317_v38  ;;  %316 = vst [vmem:[#allocation2 + $0x18] sm:$0xf] %v315_v39  ;;  %v250_v45 = vrot.slane %v246_v36, 4  ;;  %364 = vrot.lane.b32.xlu1 %v148_v18, %s1863_s15  ;;  %v231_v49 = vshll.u32 %v146_v31, 16  ;;  %v181_v52 = vld [vmem:[#allocation2 + $0x28] sm:$0x1]  ;;  %366 = vrot.lane.b32.xlu2 %v149_v46, %s1863_s15 }
  0x1a   : > { %319 = vst [vmem:[#allocation2 + $0x1c] sm:$0x1] %v318_v43  ;;  %v302_v47 = vld [vmem:[#allocation2 + $0x8] sm:$0xf]  ;;  %v230_v48 = vrot.slane %v228_v42, 7  ;;  %360 = vrot.lane.b32.xlu0 %v146_v31, %s1863_s15  ;;  %v199_v55 = vsel %vm1897_vm6, 0, %v198_v41 }
  0x1b   : > { %v305_v50 = vld [vmem:[#allocation2 + $0xc] sm:$0x1]  ;;  %v303_v51 = vsel %vm1925_vm9, %v225_v34, %v302_v47  ;;  %174 = vst [vmem:[#allocation2 + $0x10] sm:$0x1] %v173_v40  ;;  %v182_v60 = vsel %vm1891_vm5, 0, %v181_v52  ;;  %v252_v62 = vshrl.u32 %v149_v46, 16 }
  0x1c   : > { %v306_v53 = vsel %vm1891_vm5, %v226_v35, %v305_v50  ;;  %304 = vst [vmem:[#allocation2 + $0x8] sm:$0xf] %v303_v51  ;;  %v320_v54 = vld [vmem:[#allocation2 + $0x20] sm:$0xf]  ;;  %v207_v58 = vld [vmem:[#allocation2 + $0x2c] sm:$0x1]  ;;  %v233_v63 = vor.u32 %v231_v49, %v230_v48 }
  0x1d   : > { %307 = vst [vmem:[#allocation2 + $0xc] sm:$0x1] %v306_v53  ;;  %v321_v56 = vsel %vm1925_vm9, %v249_v44, %v320_v54  ;;  %v323_v57 = vld [vmem:[#allocation2 + $0x24] sm:$0x1]  ;;  %v208_v61 = vsel %vm1897_vm6, 0, %v207_v58  ;;  %v254_v4 = vrot.slane %v252_v62, 7 }
  0x1e   : > { %v324_v59 = vsel %vm1891_vm5, %v250_v45, %v323_v57  ;;  %322 = vst [vmem:[#allocation2 + $0x20] sm:$0xf] %v321_v56  ;;  %v152_v0 = vld [vmem:[%s1907_s14 + $0x1c] sm:$0xf]  ;;  %v190_v1 = vld [vmem:[#allocation2 + $0x40] sm:$0x1] }
  0x1f   : > { %325 = vst [vmem:[#allocation2 + $0x24] sm:$0x1] %v324_v59  ;;  %v191_v2 = vsel %vm1891_vm5, 0, %v190_v1  ;;  %v216_v3 = vld [vmem:[#allocation2 + $0x44] sm:$0x1]  ;;  %v255_v6 = vshll.u32 %v149_v46, 16 }
  0x20   : > { %200 = vst [vmem:[#allocation2 + $0x14] sm:$0x1] %v199_v55  ;;  %v276_v7 = vshrl.u32 %v152_v0, 16  ;;  %v234_v9 = vrot.slane %v230_v48, 4  ;;  %v217_v11 = vsel %vm1897_vm6, 0, %v216_v3  ;;  %v279_v14 = vshll.u32 %v152_v0, 16 }
  0x21   : > { %183 = vst [vmem:[#allocation2 + $0x28] sm:$0x1] %v182_v60  ;;  %372 = vrot.lane.b32.xlu1 %v152_v0, %s1863_s15  ;;  %v151_v15 = vld [vmem:[%s1907_s14 + $0x18] sm:$0xf]  ;;  %v213_v17 = vld [vmem:[#allocation2 + $0x3c] sm:$0x1]  ;;  %v257_v18 = vor.u32 %v255_v6, %v254_v4 }
  0x22   : > { %v308_v10 = vld [vmem:[#allocation2 + $0x10] sm:$0xf]  ;;  %209 = vst [vmem:[#allocation2 + $0x2c] sm:$0x1] %v208_v61  ;;  %v278_v13 = vrot.slane %v276_v7, 7  ;;  %370 = vrot.lane.b32.xlu0 %v151_v15, %s1863_s15  ;;  %v258_v19 = vrot.slane %v254_v4, 4 }
  0x23   : > { %v309_v12 = vsel %vm1925_vm9, %v233_v63, %v308_v10  ;;  %192 = vst [vmem:[#allocation2 + $0x40] sm:$0x1] %v191_v2  ;;  %v187_v16 = vld [vmem:[#allocation2 + $0x38] sm:$0x1]  ;;  %v214_v21 = vsel %vm1897_vm6, 0, %v213_v17  ;;  %v268_v22 = vshrl.u32 %v151_v15, 16 }
  0x24   : > { %310 = vst [vmem:[#allocation2 + $0x10] sm:$0xf] %v309_v12  ;;  %v188_v20 = vsel %vm1891_vm5, 0, %v187_v16  ;;  %v271_v23 = vshll.u32 %v151_v15, 16  ;;  %v150_v24 = vld [vmem:[%s1907_s14 + $0x14] sm:$0xf]  ;;  %v281_v26 = vor.u32 %v279_v14, %v278_v13 }
  0x25   : > { %218 = vst [vmem:[#allocation2 + $0x44] sm:$0x1] %v217_v11  ;;  %v184_v27 = vld [vmem:[#allocation2 + $0x30] sm:$0x1]  ;;  %368 = vrot.lane.b32.xlu2 %v150_v24, %s1863_s15  ;;  %v270_v30 = vrot.slane %v268_v22, 7  ;;  %v282_v34 = vrot.slane %v278_v13, 4 }
  0x26   : > { %189 = vst [vmem:[#allocation2 + $0x38] sm:$0x1] %v188_v20  ;;  %v260_v35 = vshrl.u32 %v150_v24, 16  ;;  %v185_v39 = vsel %vm1891_vm5, 0, %v184_v27  ;;  %v210_v42 = vld [vmem:[#allocation2 + $0x34] sm:$0x1] }
  0x27   : > { %v311_v25 = vld [vmem:[#allocation2 + $0x14] sm:$0x1]  ;;  %215 = vst [vmem:[#allocation2 + $0x3c] sm:$0x1] %v214_v21  ;;  %v273_v38 = vor.u32 %v271_v23, %v270_v30  ;;  %v274_v41 = vrot.slane %v270_v30, 4  ;;  %v263_v47 = vshll.u32 %v150_v24, 16 }
  0x28   : > { %v312_v28 = vsel %vm1891_vm5, %v234_v9, %v311_v25  ;;  %v326_v29 = vld [vmem:[#allocation2 + $0x28] sm:$0xf]  ;;  %186 = vst [vmem:[#allocation2 + $0x30] sm:$0x1] %v185_v39  ;;  %v262_v46 = vrot.slane %v260_v35, 7  ;;  %v211_v50 = vsel %vm1897_vm6, 0, %v210_v42 }
  0x29   : > { %313 = vst [vmem:[#allocation2 + $0x14] sm:$0x1] %v312_v28  ;;  %v329_v31 = vld [vmem:[#allocation2 + $0x2c] sm:$0x1]  ;;  %v327_v33 = vsel %vm1925_vm9, %v257_v18, %v326_v29  ;;  %v416_v8 = vld [vmem:[%s2380_s1] sm:$0xf] }
  0x2a   : > { %v330_v36 = vsel %vm1891_vm5, %v258_v19, %v329_v31  ;;  %328 = vst [vmem:[#allocation2 + $0x28] sm:$0xf] %v327_v33  ;;  %v344_v37 = vld [vmem:[#allocation2 + $0x40] sm:$0xf]  ;;  %v265_v52 = vor.u32 %v263_v47, %v262_v46  ;;  %v266_v54 = vrot.slane %v262_v46, 4  ;;  %v1864_v58 = vmov 0  }
  0x2b   : > { %331 = vst [vmem:[#allocation2 + $0x2c] sm:$0x1] %v330_v36  ;;  %v345_v40 = vsel %vm1925_vm9, %v281_v26, %v344_v37  ;;  %v518_v59 = vsel %vm452_vm11, %v416_v8, 0  ;;  %v1723_v32 = vld [vmem:[%s2380_s1 + $0x4] sm:$0xf]  ;;  %vm382_vm12 = vcmask 60448  }
  0x2c   : > { %v347_v43 = vld [vmem:[#allocation2 + $0x44] sm:$0x1]  ;;  %346 = vst [vmem:[#allocation2 + $0x40] sm:$0xf] %v345_v40  ;;  %527 = vmatpush.bf16.msra.mxu1 %v518_v59  ;;  %v1765_v5 = vld [vmem:[%s2380_s1 + $0x14] sm:$0xf] }
  0x2d   : > { %v348_v44 = vsel %vm1891_vm5, %v282_v34, %v347_v43  ;;  %v338_v45 = vld [vmem:[#allocation2 + $0x38] sm:$0xf]  ;;  %212 = vst [vmem:[#allocation2 + $0x34] sm:$0x1] %v211_v50  ;;  %v1764_v60 = vld [vmem:[%s2380_s1 + $0x10] sm:$0xf] }
  0x2e   : > { %349 = vst [vmem:[#allocation2 + $0x44] sm:$0x1] %v348_v44  ;;  %v339_v48 = vsel %vm1925_vm9, %v273_v38, %v338_v45  ;;  %v341_v49 = vld [vmem:[#allocation2 + $0x3c] sm:$0x1]  ;;  %v454_v61 = vsel %vm452_vm11, %v1723_v32, 0  ;;  %v646_v62 = vsel %vm452_vm11, %v1765_v5, 0 }
  0x2f   : > { %v342_v51 = vsel %vm1891_vm5, %v274_v41, %v341_v49  ;;  %340 = vst [vmem:[#allocation2 + $0x38] sm:$0xf] %v339_v48  ;;  %v332_v53 = vld [vmem:[#allocation2 + $0x30] sm:$0xf]  ;;  %v678_v63 = vsel %vm452_vm11, %v1764_v60, 0  ;;  %463 = vmatpush.bf16.msra.mxu0 %v454_v61  ;;  %655 = vmatpush.bf16.msra.mxu2 %v646_v62  ;;  %vm439_vm13 = vcmask 64512  }
  0x30   : > { %343 = vst [vmem:[#allocation2 + $0x3c] sm:$0x1] %v342_v51  ;;  %v333_v55 = vsel %vm1925_vm9, %v265_v52, %v332_v53  ;;  %687 = vmatpush.bf16.msra.mxu3 %v678_v63  ;;  %v1809_v1 = vld [vmem:[%s2380_s1 + $0x1c] sm:$0xf]  ;;  %v1808_v2 = vld [vmem:[%s2380_s1 + $0x18] sm:$0xf] }
  0x31   : > { %334 = vst [vmem:[#allocation2 + $0x30] sm:$0xf] %v333_v55  ;;  %v1799_v3 = vld [vmem:[%s2380_s1 + $0xc] sm:$0xf]  ;;  %v1395_v4 = vsel %vm452_vm11, %v1809_v1, 0  ;;  %v1427_v6 = vsel %vm452_vm11, %v1808_v2, 0 }
  0x32   : > { %154 = vst.msk [vmem:[#allocation2] sm:$0xf] %vm153_vm10, %v1864_v58  ;;  %v1186_v7 = vsel %vm452_vm11, %v1799_v3, 0  ;;  %v1798_v9 = vld [vmem:[%s2380_s1 + $0x8] sm:$0xf]  ;;  %vm1357_vm1 = vcmask 130112  }
  0x33   : > { %162 = vst.msk [vmem:[#allocation2 + $0x48] sm:$0xf] %vm153_vm10, %v1864_v58  ;;  %1404 = vmatpush.bf16.msrb.mxu2 %v1395_v4  ;;  %v1242_v10 = vsel %vm452_vm11, %v1798_v9, 0  ;;  %1195 = vmatpush.bf16.msrb.mxu0 %v1186_v7  ;;  %vm786_vm14 = vsmask.f32 3328 }
  0x34   : > { %v335_v56 = vld [vmem:[#allocation2 + $0x34] sm:$0x1]  ;;  %1436 = vmatpush.bf16.msrb.mxu3 %v1427_v6  ;;  %1251 = vmatpush.bf16.msrb.mxu1 %v1242_v10  ;;  %v902_v32 = vld [vmem:[#allocation2 + $0xc] sm:$0x1]  ;;  %vm787_vm15 = vsmask.f32 7440 }
  0x35   : > { %v336_v57 = vsel %vm1891_vm5, %v266_v54, %v335_v56  ;;  %v771_v54 = vld [vmem:[#allocation2 + $0x4] sm:$0x1]  ;;  %v773_v56 = vld [vmem:[#allocation2 + $0xc] sm:$0x1]  ;;  %v927_v4 = vshll.u32 %v902_v32, 16  ;;  %vm2045_vm0 = vmor %vm786_vm14, %vm787_vm15  ;;  %vm1642_vm5 = vcmask 130048  }
  0x36   : > { %337 = vst [vmem:[#allocation2 + $0x34] sm:$0x1] %v336_v57  ;;  %v799_v59 = vshll.u32 %v771_v54, 16  ;;  %v813_v2 = vshll.u32 %v773_v56, 16  ;;  %v777_v56 = vld [vmem:[#allocation2 + $0x1c] sm:$0x1] }
  0x38   : > { %v801_v7 = vrot.slane %v799_v59, 5  ;;  %v906_v59 = vld [vmem:[#allocation2 + $0x1c] sm:$0x1] }
  0x39   : > { %v1746_v14 = vld [vmem:[#allocation2] sm:$0xf] }
  0x3a   : > { %v770_v39 = vld [vmem:[#allocation2] sm:$0xf] }
  0x3b   : > { %v790_v41 = vshrl.u32 %v770_v39, 16  ;;  %v793_v42 = vshll.u32 %v770_v39, 16 }
  0x3d   : > { %v792_v51 = vrot.slane %v790_v41, 4  ;;  %v795_v52 = vrot.slane %v793_v42, 5 }
  0x3f   : > { %v796_v58 = vor.u32 %v795_v52, %v792_v51 }
  0x41   : > { %v797_v6 = vrot.slane %v796_v58, 4 }
  0x73   : > { %v367_v0 = vpop.permute.xlu2 %366 }
  0x74   : > { %387 = vst.msk [vmem:[#allocation2 + $0x28] sm:$0xf] %vm382_vm12, %v367_v0 }
  0x7b   : > { %v1839_v31 = vld [vmem:[#allocation2 + $0x24] sm:$0xf0] }
  0x7c   : > { %v1832_v38 = vld [vmem:[#allocation2 + $0x24] sm:$0xf0] }
  0x7d   : > { %v1734_v46 = vld [vmem:[#allocation2 + $0x28] sm:$0xf] }
  0x7f   : > { %v369_v11 = vpop.permute.xlu2 %368 }
  0x80   : > { %388 = vst.msk [vmem:[#allocation2 + $0x30] sm:$0xf] %vm382_vm12, %v369_v11 }
  0x83   : > { %v363_v12 = vpop.permute.xlu1 %362 }
  0x84   : > { %v359_v13 = vpop.permute.xlu0 %358  ;;  %385 = vst.msk [vmem:[#allocation2 + $0x18] sm:$0xf] %vm382_vm12, %v363_v12 }
  0x85   : > { %383 = vst.msk [vmem:[#allocation2 + $0x8] sm:$0xf] %vm382_vm12, %v359_v13  ;;  %v904_v13 = vld [vmem:[#allocation2 + $0x14] sm:$0x1] }
  0x87   : > { %v1776_v43 = vld [vmem:[#allocation2 + $0x30] sm:$0xf] }
  0x88   : > { %v1836_v47 = vld [vmem:[#allocation2 + $0x2c] sm:$0xf0] }
  0x89   : > { %v1735_v53 = vor.u32 %v1836_v47, %v1734_v46  ;;  %v1758_v62 = vld [vmem:[#allocation2 + $0x30] sm:$0xf] }
  0x8b   : > { %v365_v15 = vpop.permute.xlu1 %364  ;;  %v1838_v19 = vld [vmem:[#allocation2 + $0x14] sm:$0xf0] }
  0x8c   : > { %v361_v16 = vpop.permute.xlu0 %360  ;;  %386 = vst.msk [vmem:[#allocation2 + $0x20] sm:$0xf] %vm382_vm12, %v365_v15  ;;  %v1830_v17 = vld [vmem:[#allocation2 + $0x4] sm:$0xf0]  ;;  %v1831_v28 = vld [vmem:[#allocation2 + $0x14] sm:$0xf0] }
  0x8d   : > { %384 = vst.msk [vmem:[#allocation2 + $0x10] sm:$0xf] %vm382_vm12, %v361_v16  ;;  %v1747_v18 = vor.u32 %v1830_v17, %v1746_v14  ;;  %v1726_v21 = vld [vmem:[#allocation2 + $0x8] sm:$0xf]  ;;  %v1730_v33 = vld [vmem:[#allocation2 + $0x18] sm:$0xf] }
  0x8e   : > { %v772_v45 = vld [vmem:[#allocation2 + $0x8] sm:$0xf]  ;;  %v1031_v55 = vld [vmem:[#allocation2 + $0x18] sm:$0xf] }
  0x8f   : > { %1760 = vmatmul.msk.bf16.vlgmr.msra.gmra.mxu1 %vm439_vm13, %v1747_v18  ;;  %v804_v49 = vshrl.u32 %v772_v45, 16  ;;  %v807_v50 = vshll.u32 %v772_v45, 16  ;;  %v1060_v60 = vshrl.u32 %v1031_v55, 16  ;;  %v1063_v61 = vshll.u32 %v1031_v55, 16  ;;  %v901_v3 = vld [vmem:[#allocation2 + $0x8] sm:$0xf] }
  0x90   : > { %v918_v16 = vshrl.u32 %v901_v3, 16  ;;  %v921_v17 = vshll.u32 %v901_v3, 16  ;;  %v1032_v18 = vld [vmem:[#allocation2 + $0x1c] sm:$0x1]  ;;  %v905_v47 = vld [vmem:[#allocation2 + $0x18] sm:$0xf] }
  0x91   : > { %v806_v57 = vrot.slane %v804_v49, 4  ;;  %v809_v8 = vrot.slane %v807_v50, 5  ;;  %v946_v32 = vshrl.u32 %v905_v47, 16 }
  0x92   : > { %v920_v39 = vrot.slane %v918_v16, 4 }
  0x93   : > { %v373_v20 = vpop.permute.xlu1 %372  ;;  %v1772_v30 = vld [vmem:[#allocation2 + $0x20] sm:$0xf]  ;;  %v810_v1 = vor.u32 %v809_v8, %v806_v57 }
  0x94   : > { %v1834_v22 = vld [vmem:[#allocation2 + $0xc] sm:$0xf0]  ;;  %390 = vst.msk [vmem:[#allocation2 + $0x40] sm:$0xf] %vm382_vm12, %v373_v20  ;;  %v371_v26 = vpop.permute.xlu0 %370  ;;  %v1835_v34 = vld [vmem:[#allocation2 + $0x1c] sm:$0xf0]  ;;  %v1773_v35 = vor.u32 %v1839_v31, %v1772_v30 }
  0x95   : > { %v1768_v23 = vld [vmem:[#allocation2 + $0x10] sm:$0xf]  ;;  %v1727_v24 = vor.u32 %v1834_v22, %v1726_v21  ;;  %389 = vst.msk [vmem:[#allocation2 + $0x38] sm:$0xf] %vm382_vm12, %v371_v26  ;;  %v1731_v36 = vor.u32 %v1835_v34, %v1730_v33  ;;  %v1754_v37 = vld [vmem:[#allocation2 + $0x20] sm:$0xf] }
  0x96   : > { %v1769_v25 = vor.u32 %v1838_v19, %v1768_v23  ;;  %v1750_v27 = vld [vmem:[#allocation2 + $0x10] sm:$0xf]  ;;  %v1755_v40 = vor.u32 %v1832_v38, %v1754_v37  ;;  %v1062_v19 = vrot.slane %v1060_v60, 4  ;;  %v1065_v20 = vrot.slane %v1063_v61, 5  ;;  %v1841_v26 = vld [vmem:[#allocation2 + $0x44] sm:$0xf0] }
  0x97   : > { %1740 = vmatmul.msk.bf16.vlgmr.msra.gmra.mxu0 %vm439_vm13, %v1727_v24  ;;  %1786 = vmatmul.msk.bf16.vlgmr.msra.gmra.mxu3 %vm439_vm13, %v1727_v24  ;;  %v1751_v29 = vor.u32 %v1831_v28, %v1750_v27  ;;  %v903_v5 = vld [vmem:[#allocation2 + $0x10] sm:$0xf]  ;;  %v811_v21 = vrot.slane %v810_v1, 4  ;;  %v815_v22 = vrot.slane %v813_v2, 5  ;;  %v2050_v23 = vrot.slane %v927_v4, 5 }
  0x98   : > { %1782 = vmatmul.msk.bf16.vlgmr.msra.gmra.mxu2 %vm439_vm13, %v1769_v25  ;;  %v1029_v0 = vld [vmem:[#allocation2 + $0x10] sm:$0xf]  ;;  %v932_v9 = vshrl.u32 %v903_v5, 16  ;;  %v935_v10 = vshll.u32 %v903_v5, 16  ;;  %v776_v24 = vld [vmem:[#allocation2 + $0x18] sm:$0xf]  ;;  %v802_v27 = vsel %vm2045_vm0, %v797_v6, %v801_v7  ;;  %v1066_v41 = vor.u32 %v1065_v20, %v1062_v19 }
  0x99   : > { %v1046_v14 = vshrl.u32 %v1029_v0, 16  ;;  %v1049_v15 = vshll.u32 %v1029_v0, 16  ;;  %v1030_v30 = vld [vmem:[#allocation2 + $0x14] sm:$0x1]  ;;  %v941_v31 = vshll.u32 %v904_v13, 16  ;;  %v832_v45 = vshrl.u32 %v776_v24, 16 }
  0x9a   : > { %v934_v28 = vrot.slane %v932_v9, 4  ;;  %v835_v46 = vshll.u32 %v776_v24, 16  ;;  %v1055_v54 = vshll.u32 %v1030_v30, 16  ;;  %v1067_v8 = vrot.slane %v1066_v41, 4  ;;  %v907_v7 = vld [vmem:[#allocation2 + $0x20] sm:$0xf] }
  0x9b   : > { %v1780_v25 = vld [vmem:[#allocation2 + $0x40] sm:$0xf]  ;;  %v1048_v33 = vrot.slane %v1046_v14, 4  ;;  %v1051_v34 = vrot.slane %v1049_v15, 5  ;;  %v834_v60 = vrot.slane %v832_v45, 4  ;;  %v943_v0 = vrot.slane %v941_v31, 5 }
  0x9c   : > { %v1840_v44 = vld [vmem:[#allocation2 + $0x34] sm:$0xf0]  ;;  %v1837_v38 = vld [vmem:[#allocation2 + $0x3c] sm:$0xf0]  ;;  %v1781_v42 = vor.u32 %v1841_v26, %v1780_v25  ;;  %v837_v61 = vrot.slane %v835_v46, 5  ;;  %v1057_v4 = vrot.slane %v1055_v54, 5 }
  0x9d   : > { %v1777_v48 = vor.u32 %v1840_v44, %v1776_v43  ;;  %v1833_v63 = vld [vmem:[#allocation2 + $0x34] sm:$0xf0]  ;;  %v1217_v43 = vunpack.c.l.b16 %v802_v27  ;;  %v775_v44 = vld [vmem:[#allocation2 + $0x14] sm:$0x1]  ;;  %v841_v6 = vshll.u32 %v777_v56, 16  ;;  %v955_v9 = vshll.u32 %v906_v59, 16 }
  0x9e   : > { %v1759_v11 = vor.u32 %v1833_v63, %v1758_v62  ;;  %v1738_v37 = vld [vmem:[#allocation2 + $0x38] sm:$0xf]  ;;  %v827_v58 = vshll.u32 %v775_v44, 16  ;;  %v949_v62 = vshll.u32 %v905_v47, 16  ;;  %v1033_v14 = vld [vmem:[#allocation2 + $0x20] sm:$0xf] }
  0x9f   : > { %1761 = vmatmul.msk.bf16.gmra.mxu1 %vm439_vm13, %v1751_v29  ;;  %v937_v29 = vrot.slane %v935_v10, 5  ;;  %v1739_v52 = vor.u32 %v1837_v38, %v1738_v37  ;;  %v1035_v15 = vld [vmem:[#allocation2 + $0x28] sm:$0xf]  ;;  %v963_v24 = vshll.u32 %v907_v7, 16  ;;  %v1074_v26 = vshrl.u32 %v1033_v14, 16 }
  0xa0   : > { %v829_v13 = vrot.slane %v827_v58, 5  ;;  %v951_v19 = vrot.slane %v949_v62, 5  ;;  %v1077_v27 = vshll.u32 %v1033_v14, 16  ;;  %v843_v30 = vrot.slane %v841_v6, 5  ;;  %v908_v38 = vld [vmem:[#allocation2 + $0x24] sm:$0x1] }
  0xa1   : > { %v938_v49 = vor.u32 %v937_v29, %v934_v28  ;;  %v1088_v28 = vshrl.u32 %v1035_v15, 16  ;;  %v2068_v31 = vrot.slane %v955_v9, 5  ;;  %v965_v44 = vrot.slane %v963_v24, 5  ;;  %v1034_v45 = vld [vmem:[#allocation2 + $0x24] sm:$0x1] }
  0xa2   : > { %v1036_v46 = vld [vmem:[#allocation2 + $0x2c] sm:$0x1]  ;;  %v1079_v47 = vrot.slane %v1077_v27, 5  ;;  %v1083_v59 = vshll.u32 %v1034_v45, 16  ;;  %v779_v62 = vld [vmem:[#allocation2 + $0x24] sm:$0x1] }
  0xa3   : > { %v939_v63 = vrot.slane %v938_v49, 4 }
  0xa5   : > { %v944_v20 = vsel %vm2045_vm0, %v939_v63, %v943_v0  ;;  %v909_v0 = vld [vmem:[#allocation2 + $0x28] sm:$0xf] }
  0xa6   : > { %v977_v27 = vshll.u32 %v909_v0, 16 }
  0xa7   : > { %1741 = vmatmul.msk.bf16.gmra.mxu0 %vm439_vm13, %v1731_v36  ;;  %1787 = vmatmul.msk.bf16.gmra.mxu3 %vm439_vm13, %v1731_v36  ;;  %v774_v36 = vld [vmem:[#allocation2 + $0x10] sm:$0xf] }
  0xa8   : > { %1783 = vmatmul.msk.bf16.gmra.mxu2 %vm439_vm13, %v1773_v35  ;;  %v1069_v35 = vshll.u32 %v1032_v18, 16  ;;  %v818_v50 = vshrl.u32 %v774_v36, 16  ;;  %v821_v51 = vshll.u32 %v774_v36, 16  ;;  %v948_v18 = vrot.slane %v946_v32, 4 }
  0xa9   : > { %v1097_v32 = vshll.u32 %v1036_v46, 16  ;;  %v979_v45 = vrot.slane %v977_v27, 5  ;;  %v912_v46 = vld [vmem:[#allocation2 + $0x34] sm:$0x1] }
  0xaa   : > { %v1071_v55 = vrot.slane %v1069_v35, 5  ;;  %v820_v1 = vrot.slane %v818_v50, 4  ;;  %v823_v2 = vrot.slane %v821_v51, 5  ;;  %v1162_v35 = vunpack.c.l.b16 %v944_v20 }
  0xaf   : > { %1762 = vmatmul.msk.bf16.gmra.mxu1 %vm439_vm13, %v1755_v40  ;;  %v923_v40 = vrot.slane %v921_v17, 5  ;;  %v838_v17 = vor.u32 %v837_v61, %v834_v60 }
  0xb1   : > { %v924_v57 = vor.u32 %v923_v40, %v920_v39  ;;  %v839_v37 = vrot.slane %v838_v17, 4  ;;  %v952_v39 = vor.u32 %v951_v19, %v948_v18  ;;  %v780_v40 = vld [vmem:[#allocation2 + $0x28] sm:$0xf]  ;;  %v1037_v17 = vld [vmem:[#allocation2 + $0x30] sm:$0xf]  ;;  %v855_v19 = vshll.u32 %v779_v62, 16 }
  0xb3   : > { %v925_v10 = vrot.slane %v924_v57, 4  ;;  %v2073_v56 = vrot.slane %v952_v39, 4  ;;  %v969_v57 = vshll.u32 %v908_v38, 16  ;;  %v857_v38 = vrot.slane %v855_v19, 5 }
  0xb5   : > { %v930_v29 = vsel %vm2045_vm0, %v925_v10, %v2050_v23  ;;  %v1076_v23 = vrot.slane %v1074_v26, 4  ;;  %v971_v10 = vrot.slane %v969_v57, 5  ;;  %v1040_v57 = vld [vmem:[#allocation2 + $0x3c] sm:$0x1] }
  0xb6   : > { %v1161_v54 = vunpack.c.l.b16 %v930_v29 }
  0xb7   : > { %1742 = vmatmul.msk.bf16.gmra.mxu0 %vm439_vm13, %v1735_v53  ;;  %1788 = vmatmul.msk.bf16.gmra.mxu3 %vm439_vm13, %v1735_v53  ;;  %v1052_v53 = vor.u32 %v1051_v34, %v1048_v33  ;;  %v1091_v33 = vshll.u32 %v1035_v15, 16  ;;  %v778_v34 = vld [vmem:[#allocation2 + $0x20] sm:$0xf]  ;;  %v1080_v61 = vor.u32 %v1079_v47, %v1076_v23  ;;  %v1085_v15 = vrot.slane %v1083_v59, 5 }
  0xb8   : > { %1784 = vmatmul.msk.bf16.gmra.mxu2 %vm439_vm13, %v1777_v48  ;;  %v816_v48 = vsel %vm2045_vm0, %v811_v21, %v815_v22  ;;  %v824_v21 = vor.u32 %v823_v2, %v820_v1  ;;  %v960_v22 = vshrl.u32 %v907_v7, 16  ;;  %v846_v49 = vshrl.u32 %v778_v34, 16  ;;  %v781_v2 = vld [vmem:[#allocation2 + $0x2c] sm:$0x1] }
  0xb9   : > { %v1218_v5 = vunpack.c.l.b16 %v816_v48  ;;  %v1053_v3 = vrot.slane %v1052_v53, 4  ;;  %v1090_v48 = vrot.slane %v1088_v28, 4  ;;  %v1093_v50 = vrot.slane %v1091_v33, 5 }
  0xba   : > { %v849_v51 = vshll.u32 %v778_v34, 16  ;;  %v863_v53 = vshll.u32 %v780_v40, 16  ;;  %v848_v63 = vrot.slane %v846_v49, 4  ;;  %v1081_v18 = vrot.slane %v1080_v61, 4 }
  0xbb   : > { %v1225_v16 = vpack.c.b16 %v1218_v5, %v1217_v43  ;;  %v1058_v25 = vsel %vm2045_vm0, %v1053_v3, %v1057_v4  ;;  %v962_v43 = vrot.slane %v960_v22, 4  ;;  %v1169_v5 = vpack.c.b16 %v1162_v35, %v1161_v54  ;;  %v1039_v22 = vld [vmem:[#allocation2 + $0x38] sm:$0xf] }
  0xbc   : > { %v1370_v41 = vunpack.c.l.b16 %v1058_v25  ;;  %v1094_v1 = vor.u32 %v1093_v50, %v1090_v48  ;;  %v851_v3 = vrot.slane %v849_v51, 5  ;;  %v865_v6 = vrot.slane %v863_v53, 5  ;;  %v1038_v50 = vld [vmem:[#allocation2 + $0x34] sm:$0x1] }
  0xbd   : > { %v966_v58 = vor.u32 %v965_v44, %v962_v43  ;;  %v869_v20 = vshll.u32 %v781_v2, 16  ;;  %v1105_v33 = vshll.u32 %v1037_v17, 16  ;;  %v1116_v35 = vshrl.u32 %v1039_v22, 16  ;;  %v910_v44 = vld [vmem:[#allocation2 + $0x2c] sm:$0x1] }
  0xbe   : > { %v1095_v24 = vrot.slane %v1094_v1, 4  ;;  %v852_v25 = vor.u32 %v851_v3, %v848_v63  ;;  %v1125_v2 = vshll.u32 %v1040_v57, 16  ;;  %v914_v57 = vld [vmem:[#allocation2 + $0x3c] sm:$0x1] }
  0xbf   : > { %1763 = vmatmul.msk.bf16.gmra.mxu1 %vm439_vm13, %v1759_v11  ;;  %v1072_v11 = vsel %vm2045_vm0, %v1067_v8, %v1071_v55  ;;  %v844_v55 = vsel %vm2045_vm0, %v839_v37, %v843_v30  ;;  %v967_v14 = vrot.slane %v966_v58, 4  ;;  %v1102_v30 = vshrl.u32 %v1037_v17, 16 }
  0xc0   : > { %v1371_v36 = vunpack.c.l.b16 %v1072_v11  ;;  %v1220_v9 = vunpack.c.l.b16 %v844_v55  ;;  %v911_v11 = vld [vmem:[#allocation2 + $0x30] sm:$0xf]  ;;  %v1086_v37 = vsel %vm2045_vm0, %v1081_v18, %v1085_v15  ;;  %v871_v39 = vrot.slane %v869_v20, 5 }
  0xc1   : > { %v988_v28 = vshrl.u32 %v911_v11, 16  ;;  %v991_v29 = vshll.u32 %v911_v11, 16  ;;  %v1104_v48 = vrot.slane %v1102_v30, 4  ;;  %v1107_v49 = vrot.slane %v1105_v33, 5  ;;  %v915_v33 = vld [vmem:[#allocation2 + $0x40] sm:$0xf] }
  0xc2   : > { %v1378_v60 = vpack.c.b16 %v1371_v36, %v1370_v41  ;;  %v1119_v36 = vshll.u32 %v1039_v22, 16  ;;  %v1118_v51 = vrot.slane %v1116_v35, 4  ;;  %v1372_v55 = vunpack.c.l.b16 %v1086_v37  ;;  %v783_v22 = vld [vmem:[#allocation2 + $0x34] sm:$0x1]  ;;  %v1041_v37 = vld [vmem:[#allocation2 + $0x40] sm:$0xf] }
  0xc3   : > { %v990_v23 = vrot.slane %v988_v28, 4  ;;  %v993_v47 = vrot.slane %v991_v29, 5  ;;  %v1108_v63 = vor.u32 %v1107_v49, %v1104_v48  ;;  %v913_v29 = vld [vmem:[#allocation2 + $0x38] sm:$0xf] }
  0xc5   : > { %v994_v62 = vor.u32 %v993_v47, %v990_v23  ;;  %v1109_v18 = vrot.slane %v1108_v63, 4  ;;  %v1130_v23 = vshrl.u32 %v1041_v37, 16  ;;  %v1133_v47 = vshll.u32 %v1041_v37, 16 }
  0xc7   : > { %1743 = vmatmul.msk.bf16.gmra.mxu0 %vm439_vm13, %v1739_v52  ;;  %1789 = vmatmul.msk.bf16.gmra.mxu3 %vm439_vm13, %v1739_v52  ;;  %v860_v52 = vshrl.u32 %v780_v40, 16  ;;  %v995_v17 = vrot.slane %v994_v62, 4  ;;  %v1132_v62 = vrot.slane %v1130_v23, 4  ;;  %v1135_v63 = vrot.slane %v1133_v47, 5 }
  0xc8   : > { %1785 = vmatmul.msk.bf16.gmra.mxu2 %vm439_vm13, %v1781_v42  ;;  %v825_v42 = vrot.slane %v824_v21, 4  ;;  %v974_v21 = vshrl.u32 %v909_v0, 16  ;;  %v1111_v0 = vshll.u32 %v1038_v50, 16 }
  0xc9   : > { %v862_v4 = vrot.slane %v860_v52, 4  ;;  %v1121_v52 = vrot.slane %v1119_v36, 5  ;;  %v883_v36 = vshll.u32 %v783_v22, 16 }
  0xca   : > { %v830_v8 = vsel %vm2045_vm0, %v825_v42, %v829_v13  ;;  %v958_v13 = vsel %vm2045_vm0, %v2073_v56, %v2068_v31  ;;  %v972_v31 = vsel %vm2045_vm0, %v967_v14, %v971_v10  ;;  %v976_v40 = vrot.slane %v974_v21, 4 }
  0xcb   : > { %v1219_v7 = vunpack.c.l.b16 %v830_v8  ;;  %v866_v26 = vor.u32 %v865_v6, %v862_v4  ;;  %v853_v42 = vrot.slane %v852_v25, 4  ;;  %v1163_v53 = vunpack.c.l.b16 %v958_v13  ;;  %v782_v8 = vld [vmem:[#allocation2 + $0x30] sm:$0xf] }
  0xcc   : > { %v1164_v54 = vunpack.c.l.b16 %v972_v31  ;;  %v980_v59 = vor.u32 %v979_v45, %v976_v40  ;;  %v1122_v1 = vor.u32 %v1121_v52, %v1118_v51  ;;  %v874_v3 = vshrl.u32 %v782_v8, 16 }
  0xcd   : > { %v1226_v34 = vpack.c.b16 %v1220_v9, %v1219_v7  ;;  %v867_v43 = vrot.slane %v866_v26, 4  ;;  %v858_v58 = vsel %vm2045_vm0, %v853_v42, %v857_v38  ;;  %v877_v4 = vshll.u32 %v782_v8, 16  ;;  %v785_v26 = vld [vmem:[#allocation2 + $0x3c] sm:$0x1]  ;;  %v1043_v38 = vld [vmem:[#allocation2 + $0x48] sm:$0xf] }
  0xce   : > { %v1170_v6 = vpack.c.b16 %v1164_v54, %v1163_v53  ;;  %v1221_v11 = vunpack.c.l.b16 %v858_v58  ;;  %v1113_v19 = vrot.slane %v1111_v0, 5  ;;  %v1123_v20 = vrot.slane %v1122_v1, 4 }
  0xcf   : > { %1804 = vmatmul.msk.bf16.vlgmr.msrb.gmra.mxu1 %vm439_vm13, %v1225_v16  ;;  %v1099_v16 = vrot.slane %v1097_v32, 5  ;;  %v983_v32 = vshll.u32 %v910_v44, 16  ;;  %v872_v61 = vsel %vm2045_vm0, %v867_v43, %v871_v39  ;;  %v1127_v21 = vrot.slane %v1125_v2, 5  ;;  %v1044_v2 = vld [vmem:[#allocation2 + $0x4c] sm:$0x1] }
  0xd0   : > { %v1222_v13 = vunpack.c.l.b16 %v872_v61  ;;  %v879_v25 = vrot.slane %v877_v4, 5  ;;  %v1114_v35 = vsel %vm2045_vm0, %v1109_v18, %v1113_v19  ;;  %v1002_v42 = vshrl.u32 %v913_v29, 16  ;;  %v1042_v61 = vld [vmem:[#allocation2 + $0x44] sm:$0x1] }
  0xd1   : > { %v1100_v41 = vsel %vm2045_vm0, %v1095_v24, %v1099_v16  ;;  %v985_v14 = vrot.slane %v983_v32, 5  ;;  %v981_v16 = vrot.slane %v980_v59, 4  ;;  %v876_v24 = vrot.slane %v874_v3, 4  ;;  %v916_v59 = vld [vmem:[#allocation2 + $0x44] sm:$0x1] }
  0xd2   : > { %v1373_v56 = vunpack.c.l.b16 %v1100_v41  ;;  %v1227_v30 = vpack.c.b16 %v1222_v13, %v1221_v11  ;;  %v1128_v39 = vsel %vm2045_vm0, %v1123_v20, %v1127_v21  ;;  %v897_v41 = vshll.u32 %v785_v26, 16 }
  0xd3   : > { %v880_v40 = vor.u32 %v879_v25, %v876_v24  ;;  %v1005_v44 = vshll.u32 %v913_v29, 16  ;;  %v1016_v45 = vshrl.u32 %v915_v33, 16  ;;  %v1144_v48 = vshrl.u32 %v1043_v38, 16 }
  0xd4   : > { %v1379_v7 = vpack.c.b16 %v1373_v56, %v1372_v55  ;;  %v1147_v49 = vshll.u32 %v1043_v38, 16  ;;  %v1374_v52 = vunpack.c.l.b16 %v1114_v35  ;;  %v885_v53 = vrot.slane %v883_v36, 5 }
  0xd5   : > { %v1375_v54 = vunpack.c.l.b16 %v1128_v39  ;;  %v881_v55 = vrot.slane %v880_v40, 4  ;;  %v899_v56 = vrot.slane %v897_v41, 5  ;;  %v1004_v8 = vrot.slane %v1002_v42, 4 }
  0xd6   : > { %v1007_v32 = vrot.slane %v1005_v44, 5  ;;  %v1146_v0 = vrot.slane %v1144_v48, 4  ;;  %v1149_v1 = vrot.slane %v1147_v49, 5  ;;  %v1025_v11 = vshll.u32 %v916_v59, 16 }
  0xd7   : > { %1800 = vmatmul.msk.bf16.vlgmr.msrb.gmra.mxu0 %vm439_vm13, %v1169_v5  ;;  %1814 = vmatmul.msk.bf16.vlgmr.msrb.gmra.mxu3 %vm439_vm13, %v1169_v5  ;;  %v997_v5 = vshll.u32 %v912_v46, 16  ;;  %v1019_v46 = vshll.u32 %v915_v33, 16  ;;  %v1380_v4 = vpack.c.b16 %v1375_v54, %v1374_v52  ;;  %v1139_v13 = vshll.u32 %v1042_v61, 16 }
  0xd8   : > { %1810 = vmatmul.msk.bf16.vlgmr.msrb.gmra.mxu2 %vm439_vm13, %v1378_v60  ;;  %v784_v60 = vld [vmem:[#allocation2 + $0x38] sm:$0xf]  ;;  %v1027_v22 = vrot.slane %v1025_v11, 5 }
  0xd9   : > { %v888_v9 = vshrl.u32 %v784_v60, 16  ;;  %v891_v10 = vshll.u32 %v784_v60, 16  ;;  %v999_v15 = vrot.slane %v997_v5, 5  ;;  %v1018_v5 = vrot.slane %v1016_v45, 4 }
  0xda   : > { %v1021_v60 = vrot.slane %v1019_v46, 5  ;;  %v1141_v24 = vrot.slane %v1139_v13, 5 }
  0xdb   : > { %v890_v27 = vrot.slane %v888_v9, 4  ;;  %v893_v28 = vrot.slane %v891_v10, 5  ;;  %v1000_v31 = vsel %vm2045_vm0, %v995_v17, %v999_v15  ;;  %v1008_v10 = vor.u32 %v1007_v32, %v1004_v8 }
  0xdc   : > { %v1166_v51 = vunpack.c.l.b16 %v1000_v31  ;;  %v1136_v15 = vor.u32 %v1135_v63, %v1132_v62  ;;  %v1153_v17 = vshll.u32 %v1044_v2, 16 }
  0xdd   : > { %v894_v43 = vor.u32 %v893_v28, %v890_v27  ;;  %v1009_v21 = vrot.slane %v1008_v10, 4 }
  0xde   : > { %v1137_v26 = vrot.slane %v1136_v15, 4  ;;  %v1155_v28 = vrot.slane %v1153_v17, 5 }
  0xdf   : > { %1805 = vmatmul.msk.bf16.gmra.mxu1 %vm439_vm13, %v1226_v34  ;;  %v986_v34 = vsel %vm2045_vm0, %v981_v16, %v985_v14  ;;  %v895_v58 = vrot.slane %v894_v43, 4  ;;  %v1022_v14 = vor.u32 %v1021_v60, %v1018_v5  ;;  %v1150_v16 = vor.u32 %v1149_v1, %v1146_v0 }
  0xe0   : > { %v1165_v50 = vunpack.c.l.b16 %v986_v34  ;;  %v1142_v34 = vsel %vm2045_vm0, %v1137_v26, %v1141_v24 }
  0xe1   : > { %v900_v9 = vsel %vm2045_vm0, %v895_v58, %v899_v56  ;;  %v1023_v25 = vrot.slane %v1022_v14, 4  ;;  %v1151_v27 = vrot.slane %v1150_v16, 4  ;;  %v1376_v37 = vunpack.c.l.b16 %v1142_v34 }
  0xe2   : > { %v1171_v3 = vpack.c.b16 %v1166_v51, %v1165_v50  ;;  %v1224_v20 = vunpack.c.l.b16 %v900_v9 }
  0xe3   : > { %v1028_v33 = vsel %vm2045_vm0, %v1023_v25, %v1027_v22  ;;  %v1156_v31 = vsel %vm2045_vm0, %v1151_v27, %v1155_v28 }
  0xe4   : > { %v1168_v36 = vunpack.c.l.b16 %v1028_v33  ;;  %v1377_v38 = vunpack.c.l.b16 %v1156_v31 }
  0xe6   : > { %v1381_v40 = vpack.c.b16 %v1377_v38, %v1376_v37 }
  0xe7   : > { %1801 = vmatmul.msk.bf16.gmra.mxu0 %vm439_vm13, %v1170_v6  ;;  %1815 = vmatmul.msk.bf16.gmra.mxu3 %vm439_vm13, %v1170_v6  ;;  %v886_v6 = vsel %vm2045_vm0, %v881_v55, %v885_v53 }
  0xe8   : > { %1811 = vmatmul.msk.bf16.gmra.mxu2 %vm439_vm13, %v1379_v7  ;;  %v1011_v7 = vshll.u32 %v914_v57, 16  ;;  %v1223_v18 = vunpack.c.l.b16 %v886_v6 }
  0xea   : > { %v1013_v19 = vrot.slane %v1011_v7, 5  ;;  %v1228_v29 = vpack.c.b16 %v1224_v20, %v1223_v18 }
  0xef   : > { %1806 = vmatmul.msk.bf16.gmra.mxu1 %vm439_vm13, %v1227_v30  ;;  %v1014_v30 = vsel %vm2045_vm0, %v1009_v21, %v1013_v19 }
  0xf0   : > { %v1167_v35 = vunpack.c.l.b16 %v1014_v30 }
  0xf2   : > { %v1172_v39 = vpack.c.b16 %v1168_v36, %v1167_v35 }
  0xf7   : > { %1802 = vmatmul.msk.bf16.gmra.mxu0 %vm439_vm13, %v1171_v3  ;;  %1816 = vmatmul.msk.bf16.gmra.mxu3 %vm439_vm13, %v1171_v3 }
  0xf8   : > { %1812 = vmatmul.msk.bf16.gmra.mxu2 %vm439_vm13, %v1380_v4 }
  0xff   : > { %1807 = vmatmul.msk.bf16.gmra.mxu1 %vm439_vm13, %v1228_v29 }
 0x107   : > { %1803 = vmatmul.msk.bf16.gmra.mxu0 %vm439_vm13, %v1172_v39  ;;  %1817 = vmatmul.msk.bf16.gmra.mxu3 %vm439_vm13, %v1172_v39 }
 0x108   : > { %1813 = vmatmul.msk.bf16.gmra.mxu2 %vm439_vm13, %v1381_v40 }
 0x10c   : > { %v529_v41 = vpop.f32.mrf.mxu1 }
 0x114   : > { %v465_v12 = vpop.f32.mrf.mxu0  ;;  %v531_v42 = vpop.f32.mrf.mxu1 }
 0x115   : > { %v530_v43 = vadd.f32 %v529_v41, %v465_v12 }
 0x117   : > { %601 = vst.msk [vmem:[%s2130_s7] sm:$0xff] %vm439_vm13, %v530_v43  ;;  %v571_v48 = vmul.f32 %v530_v43, %v530_v43  ;;  %v549_v50 = vsel %vm439_vm13, %v530_v43, 0.0 }
 0x119   : > { %v579_v54 = vsel %vm439_vm13, %v571_v48, 0.0 }
 0x11a   : > { %v689_v45 = vpop.f32.mrf.mxu3 }
 0x11b   : > { %v657_v44 = vpop.f32.mrf.mxu2 }
 0x11c   : > { %v690_v46 = vadd.f32 %v689_v45, %v657_v44  ;;  %v467_v23 = vpop.f32.mrf.mxu0  ;;  %v534_v47 = vpop.f32.mrf.mxu1 }
 0x11d   : > { %v532_v49 = vadd.f32 %v531_v42, %v467_v23 }
 0x11e   : > { %1790 = vst.msk [vmem:[%s2130_s7 + $0x8] sm:$0xff] %vm439_vm13, %v690_v46  ;;  %v731_v58 = vmul.f32 %v690_v46, %v690_v46  ;;  %v709_v61 = vsel %vm439_vm13, %v690_v46, 0.0 }
 0x11f   : > { %v550_v51 = vsel %vm439_vm13, %v532_v49, 0.0  ;;  %v572_v52 = vmul.f32 %v532_v49, %v532_v49  ;;  %602 = vst.msk [vmem:[%s2130_s7 + $0x10] sm:$0xff] %vm439_vm13, %v532_v49 }
 0x120   : > { %v551_v53 = vadd.f32 %v550_v51, %v549_v50  ;;  %v739_v3 = vsel %vm439_vm13, %v731_v58, 0.0 }
 0x121   : > { %v580_v55 = vsel %vm439_vm13, %v572_v52, 0.0 }
 0x122   : > { %v581_v56 = vadd.f32 %v580_v55, %v579_v54  ;;  %v691_v8 = vpop.f32.mrf.mxu3 }
 0x123   : > { %v659_v57 = vpop.f32.mrf.mxu2 }
 0x124   : > { %v692_v59 = vadd.f32 %v691_v8, %v659_v57  ;;  %v470_v32 = vpop.f32.mrf.mxu0  ;;  %v536_v5 = vpop.f32.mrf.mxu1 }
 0x125   : > { %v535_v60 = vadd.f32 %v534_v47, %v470_v32 }
 0x126   : > { %v710_v62 = vsel %vm439_vm13, %v692_v59, 0.0  ;;  %v732_v63 = vmul.f32 %v692_v59, %v692_v59  ;;  %1791 = vst.msk [vmem:[%s2130_s7 + $0x18] sm:$0xff] %vm439_vm13, %v692_v59 }
 0x127   : > { %v711_v0 = vadd.f32 %v710_v62, %v709_v61  ;;  %v552_v1 = vsel %vm439_vm13, %v535_v60, 0.0  ;;  %v573_v2 = vmul.f32 %v535_v60, %v535_v60  ;;  %603 = vst.msk [vmem:[%s2130_s7 + $0x20] sm:$0xff] %vm439_vm13, %v535_v60 }
 0x128   : > { %v740_v4 = vsel %vm439_vm13, %v732_v63, 0.0  ;;  %v553_v6 = vadd.f32 %v552_v1, %v551_v53 }
 0x129   : > { %v741_v7 = vadd.f32 %v740_v4, %v739_v3  ;;  %v582_v9 = vsel %vm439_vm13, %v573_v2, 0.0 }
 0x12a   : > { %v583_v10 = vadd.f32 %v582_v9, %v581_v56  ;;  %v694_v13 = vpop.f32.mrf.mxu3 }
 0x12b   : > { %v662_v11 = vpop.f32.mrf.mxu2 }
 0x12c   : > { %v695_v14 = vadd.f32 %v694_v13, %v662_v11  ;;  %v472_v15 = vpop.f32.mrf.mxu0  ;;  %v539_v16 = vpop.f32.mrf.mxu1 }
 0x12d   : > { %v537_v17 = vadd.f32 %v536_v5, %v472_v15 }
 0x12e   : > { %v712_v18 = vsel %vm439_vm13, %v695_v14, 0.0  ;;  %v733_v19 = vmul.f32 %v695_v14, %v695_v14  ;;  %1792 = vst.msk [vmem:[%s2130_s7 + $0x28] sm:$0xff] %vm439_vm13, %v695_v14 }
 0x12f   : > { %v713_v20 = vadd.f32 %v712_v18, %v711_v0  ;;  %v554_v21 = vsel %vm439_vm13, %v537_v17, 0.0  ;;  %v574_v22 = vmul.f32 %v537_v17, %v537_v17  ;;  %604 = vst.msk [vmem:[%s2130_s7 + $0x30] sm:$0xff] %vm439_vm13, %v537_v17 }
 0x130   : > { %v742_v24 = vsel %vm439_vm13, %v733_v19, 0.0  ;;  %v555_v25 = vadd.f32 %v554_v21, %v553_v6 }
 0x131   : > { %v743_v26 = vadd.f32 %v742_v24, %v741_v7  ;;  %v584_v27 = vsel %vm439_vm13, %v574_v22, 0.0 }
 0x132   : > { %v585_v28 = vadd.f32 %v584_v27, %v583_v10  ;;  %v696_v30 = vpop.f32.mrf.mxu3 }
 0x133   : > { %v664_v29 = vpop.f32.mrf.mxu2 }
 0x134   : > { %v697_v33 = vadd.f32 %v696_v30, %v664_v29  ;;  %v475_v34 = vpop.f32.mrf.mxu0  ;;  %v541_v31 = vpop.f32.mrf.mxu1 }
 0x135   : > { %v540_v35 = vadd.f32 %v539_v16, %v475_v34 }
 0x136   : > { %v714_v36 = vsel %vm439_vm13, %v697_v33, 0.0  ;;  %v734_v37 = vmul.f32 %v697_v33, %v697_v33  ;;  %1793 = vst.msk [vmem:[%s2130_s7 + $0x38] sm:$0xff] %vm439_vm13, %v697_v33 }
 0x137   : > { %v715_v38 = vadd.f32 %v714_v36, %v713_v20  ;;  %v556_v39 = vsel %vm439_vm13, %v540_v35, 0.0  ;;  %v575_v40 = vmul.f32 %v540_v35, %v540_v35  ;;  %605 = vst.msk [vmem:[%s2130_s7 + $0x40] sm:$0xff] %vm439_vm13, %v540_v35 }
 0x138   : > { %v744_v41 = vsel %vm439_vm13, %v734_v37, 0.0  ;;  %v557_v12 = vadd.f32 %v556_v39, %v555_v25 }
 0x139   : > { %v745_v42 = vadd.f32 %v744_v41, %v743_v26  ;;  %v586_v43 = vsel %vm439_vm13, %v575_v40, 0.0 }
 0x13a   : > { %v587_v44 = vadd.f32 %v586_v43, %v585_v28  ;;  %v699_v46 = vpop.f32.mrf.mxu3 }
 0x13b   : > { %v667_v45 = vpop.f32.mrf.mxu2 }
 0x13c   : > { %v700_v23 = vadd.f32 %v699_v46, %v667_v45  ;;  %v477_v47 = vpop.f32.mrf.mxu0  ;;  %v544_v48 = vpop.f32.mrf.mxu1 }
 0x13d   : > { %v542_v49 = vadd.f32 %v541_v31, %v477_v47 }
 0x13e   : > { %v716_v50 = vsel %vm439_vm13, %v700_v23, 0.0  ;;  %v735_v51 = vmul.f32 %v700_v23, %v700_v23  ;;  %1794 = vst.msk [vmem:[%s2130_s7 + $0x48] sm:$0xff] %vm439_vm13, %v700_v23 }
 0x13f   : > { %v717_v52 = vadd.f32 %v716_v50, %v715_v38  ;;  %v558_v53 = vsel %vm439_vm13, %v542_v49, 0.0  ;;  %v576_v54 = vmul.f32 %v542_v49, %v542_v49  ;;  %606 = vst.msk [vmem:[%s2130_s7 + $0x50] sm:$0xff] %vm439_vm13, %v542_v49 }
 0x140   : > { %v746_v55 = vsel %vm439_vm13, %v735_v51, 0.0  ;;  %v559_v56 = vadd.f32 %v558_v53, %v557_v12 }
 0x141   : > { %v747_v57 = vadd.f32 %v746_v55, %v745_v42  ;;  %v588_v8 = vsel %vm439_vm13, %v576_v54, 0.0 }
 0x142   : > { %v589_v58 = vadd.f32 %v588_v8, %v587_v44  ;;  %v701_v32 = vpop.f32.mrf.mxu3 }
 0x143   : > { %v669_v59 = vpop.f32.mrf.mxu2 }
 0x144   : > { %v702_v5 = vadd.f32 %v701_v32, %v669_v59  ;;  %v480_v60 = vpop.f32.mrf.mxu0  ;;  %v546_v61 = vpop.f32.mrf.mxu1 }
 0x145   : > { %v545_v62 = vadd.f32 %v544_v48, %v480_v60 }
 0x146   : > { %v718_v63 = vsel %vm439_vm13, %v702_v5, 0.0  ;;  %v736_v0 = vmul.f32 %v702_v5, %v702_v5  ;;  %1795 = vst.msk [vmem:[%s2130_s7 + $0x58] sm:$0xff] %vm439_vm13, %v702_v5 }
 0x147   : > { %v719_v1 = vadd.f32 %v718_v63, %v717_v52  ;;  %v560_v2 = vsel %vm439_vm13, %v545_v62, 0.0  ;;  %v577_v3 = vmul.f32 %v545_v62, %v545_v62  ;;  %607 = vst.msk [vmem:[%s2130_s7 + $0x60] sm:$0xff] %vm439_vm13, %v545_v62 }
 0x148   : > { %v748_v4 = vsel %vm439_vm13, %v736_v0, 0.0  ;;  %v561_v6 = vadd.f32 %v560_v2, %v559_v56 }
 0x149   : > { %v749_v7 = vadd.f32 %v748_v4, %v747_v57  ;;  %v590_v9 = vsel %vm439_vm13, %v577_v3, 0.0 }
 0x14a   : > { %v591_v10 = vadd.f32 %v590_v9, %v589_v58  ;;  %v704_v13 = vpop.f32.mrf.mxu3 }
 0x14b   : > { %v672_v11 = vpop.f32.mrf.mxu2 }
 0x14c   : > { %v705_v14 = vadd.f32 %v704_v13, %v672_v11  ;;  %v482_v15 = vpop.f32.mrf.mxu0  ;;  %v1253_v16 = vpop.f32.mrf.mxu1 }
 0x14d   : > { %v547_v17 = vadd.f32 %v546_v61, %v482_v15 }
 0x14e   : > { %v720_v18 = vsel %vm439_vm13, %v705_v14, 0.0  ;;  %v737_v19 = vmul.f32 %v705_v14, %v705_v14  ;;  %1796 = vst.msk [vmem:[%s2130_s7 + $0x68] sm:$0xff] %vm439_vm13, %v705_v14 }
 0x14f   : > { %v721_v20 = vadd.f32 %v720_v18, %v719_v1  ;;  %v562_v21 = vsel %vm439_vm13, %v547_v17, 0.0  ;;  %v578_v22 = vmul.f32 %v547_v17, %v547_v17  ;;  %608 = vst.msk [vmem:[%s2130_s7 + $0x70] sm:$0xff] %vm439_vm13, %v547_v17 }
 0x150   : > { %v750_v24 = vsel %vm439_vm13, %v737_v19, 0.0  ;;  %v563_v25 = vadd.f32 %v562_v21, %v561_v6 }
 0x151   : > { %v751_v26 = vadd.f32 %v750_v24, %v749_v7  ;;  %v592_v27 = vsel %vm439_vm13, %v578_v22, 0.0 }
 0x152   : > { %v564_v28 = vrot.slane %v563_v25, 4  ;;  %v593_v29 = vadd.f32 %v592_v27, %v591_v10  ;;  %v706_v33 = vpop.f32.mrf.mxu3 }
 0x153   : > { %v674_v30 = vpop.f32.mrf.mxu2 }
 0x154   : > { %v565_v34 = vadd.f32 %v564_v28, %v563_v25  ;;  %v594_v31 = vrot.slane %v593_v29, 4  ;;  %v707_v35 = vadd.f32 %v706_v33, %v674_v30  ;;  %v1197_v36 = vpop.f32.mrf.mxu0  ;;  %v1255_v37 = vpop.f32.mrf.mxu1 }
 0x155   : > { %v2192_v38 = vadd.f32 %v1253_v16, %v1197_v36 }
 0x156   : > { %v595_v39 = vadd.f32 %v594_v31, %v593_v29  ;;  %v722_v40 = vsel %vm439_vm13, %v707_v35, 0.0  ;;  %v738_v41 = vmul.f32 %v707_v35, %v707_v35  ;;  %1797 = vst.msk [vmem:[%s2130_s7 + $0x78] sm:$0xff] %vm439_vm13, %v707_v35  ;;  %v566_v12 = vrot.slane %v565_v34, 2 }
 0x157   : > { %v723_v42 = vadd.f32 %v722_v40, %v721_v20  ;;  %1333 = vrot.lane.b32.xlu2 %v2192_v38, %s1865_s8  ;;  %v1295_v33 = vmul.f32 %v2192_v38, %v2192_v38  ;;  %v1273_v36 = vsel %vm439_vm13, %v2192_v38, 0.0 }
 0x158   : > { %v752_v43 = vsel %vm439_vm13, %v738_v41, 0.0  ;;  %v596_v44 = vrot.slane %v595_v39, 2  ;;  %v567_v47 = vadd.f32 %v566_v12, %v565_v34 }
 0x159   : > { %v724_v45 = vrot.slane %v723_v42, 4  ;;  %v753_v46 = vadd.f32 %v752_v43, %v751_v26 }
 0x15a   : > { %v1438_v50 = vpop.f32.mrf.mxu3  ;;  %v597_v54 = vadd.f32 %v596_v44, %v595_v39  ;;  %v568_v8 = vrot.slane %v567_v47, 1 }
 0x15b   : > { %v1406_v23 = vpop.f32.mrf.mxu2  ;;  %v725_v48 = vadd.f32 %v724_v45, %v723_v42  ;;  %v754_v49 = vrot.slane %v753_v46, 4 }
 0x15c   : > { %v2200_v51 = vadd.f32 %v1438_v50, %v1406_v23  ;;  %v1199_v52 = vpop.f32.mrf.mxu0  ;;  %v1258_v53 = vpop.f32.mrf.mxu1  ;;  %v598_v32 = vrot.slane %v597_v54, 1  ;;  %v569_v0 = vadd.f32 %v568_v8, %v567_v47 }
 0x15d   : > { %v726_v55 = vrot.slane %v725_v48, 2  ;;  %v755_v56 = vadd.f32 %v754_v49, %v753_v46  ;;  %v1256_v57 = vadd.f32 %v1255_v37, %v1199_v52  ;;  %v1303_v37 = vsel %vm439_vm13, %v1295_v33, 0.0 }
 0x15e   : > { %1518 = vrot.lane.b32.xlu1 %v2200_v51, %s1865_s8  ;;  %v599_v6 = vadd.f32 %v598_v32, %v597_v54  ;;  %v1480_v39 = vmul.f32 %v2200_v51, %v2200_v51  ;;  %v1458_v46 = vsel %vm439_vm13, %v2200_v51, 0.0 }
 0x15f   : > { %v727_v58 = vadd.f32 %v726_v55, %v725_v48  ;;  %v756_v59 = vrot.slane %v755_v56, 2  ;;  %1335 = vrot.lane.b32.xlu0 %v1256_v57, %s1865_s8  ;;  %v1296_v34 = vmul.f32 %v1256_v57, %v1256_v57  ;;  %v1274_v31 = vsel %vm439_vm13, %v1256_v57, 0.0 }
 0x160   : > { %v1275_v23 = vadd.f32 %v1274_v31, %v1273_v36  ;;  %v1488_v54 = vsel %vm439_vm13, %v1480_v39, 0.0 }
 0x161   : > { %v728_v5 = vrot.slane %v727_v58, 1  ;;  %v757_v60 = vadd.f32 %v756_v59, %v755_v56  ;;  %v1304_v12 = vsel %vm439_vm13, %v1296_v34, 0.0 }
 0x162   : > { %v1440_v63 = vpop.f32.mrf.mxu3  ;;  %v1305_v55 = vadd.f32 %v1304_v12, %v1303_v37 }
 0x163   : > { %v1408_v61 = vpop.f32.mrf.mxu2  ;;  %v758_v62 = vrot.slane %v757_v60, 1  ;;  %v729_v1 = vadd.f32 %v728_v5, %v727_v58 }
 0x164   : > { %v1441_v2 = vadd.f32 %v1440_v63, %v1408_v61  ;;  %v1202_v3 = vpop.f32.mrf.mxu0  ;;  %v1260_v4 = vpop.f32.mrf.mxu1 }
 0x165   : > { %v759_v7 = vadd.f32 %v758_v62, %v757_v60  ;;  %v1259_v9 = vadd.f32 %v1258_v53, %v1202_v3  ;;  %v2205_v10 = vadd.f32 %v729_v1, %v569_v0 }
 0x166   : > { %1520 = vrot.lane.b32.xlu2 %v1441_v2, %s1865_s8  ;;  %v1481_v42 = vmul.f32 %v1441_v2, %v1441_v2  ;;  %v1459_v38 = vsel %vm439_vm13, %v1441_v2, 0.0 }
 0x167   : > { %v2208_v11 = vadd.f32 %v759_v7, %v599_v6  ;;  %1337 = vrot.lane.b32.xlu1 %v1259_v9, %s1865_s8  ;;  %v1297_v35 = vmul.f32 %v1259_v9, %v1259_v9  ;;  %v1276_v43 = vsel %vm439_vm13, %v1259_v9, 0.0  ;;  %v1460_v32 = vadd.f32 %v1459_v38, %v1458_v46 }
 0x168   : > { %v1277_v56 = vadd.f32 %v1276_v43, %v1275_v23  ;;  %v1489_v51 = vsel %vm439_vm13, %v1481_v42, 0.0 }
 0x169   : > { %v1306_v49 = vsel %vm439_vm13, %v1297_v35, 0.0  ;;  %v1490_v2 = vadd.f32 %v1489_v51, %v1488_v54 }
 0x16a   : > { %v1443_v14 = vpop.f32.mrf.mxu3  ;;  %v1307_v5 = vadd.f32 %v1306_v49, %v1305_v55 }
 0x16b   : > { %v1411_v13 = vpop.f32.mrf.mxu2 }
 0x16c   : > { %v1444_v15 = vadd.f32 %v1443_v14, %v1411_v13  ;;  %v1204_v16 = vpop.f32.mrf.mxu0  ;;  %v1263_v18 = vpop.f32.mrf.mxu1 }
 0x16d   : > { %v1261_v17 = vadd.f32 %v1260_v4, %v1204_v16 }
 0x16e   : > { %1522 = vrot.lane.b32.xlu0 %v1444_v15, %s1865_s8  ;;  %v1482_v57 = vmul.f32 %v1444_v15, %v1444_v15  ;;  %v1461_v60 = vsel %vm439_vm13, %v1444_v15, 0.0 }
 0x16f   : > { %1339 = vrot.lane.b32.xlu2 %v1261_v17, %s1865_s8  ;;  %v1298_v44 = vmul.f32 %v1261_v17, %v1261_v17  ;;  %v1278_v50 = vsel %vm439_vm13, %v1261_v17, 0.0  ;;  %v1462_v9 = vadd.f32 %v1461_v60, %v1460_v32 }
 0x170   : > { %v1279_v61 = vadd.f32 %v1278_v50, %v1277_v56  ;;  %v1491_v3 = vsel %vm439_vm13, %v1482_v57, 0.0 }
 0x171   : > { %v1308_v8 = vsel %vm439_vm13, %v1298_v44, 0.0 }
 0x172   : > { %v1445_v20 = vpop.f32.mrf.mxu3  ;;  %v1309_v4 = vadd.f32 %v1308_v8, %v1307_v5 }
 0x173   : > { %v1413_v19 = vpop.f32.mrf.mxu2 }
 0x174   : > { %v2213_v21 = vadd.f32 %v1445_v20, %v1413_v19  ;;  %v1207_v22 = vpop.f32.mrf.mxu0  ;;  %v1265_v25 = vpop.f32.mrf.mxu1 }
 0x175   : > { %v1264_v24 = vadd.f32 %v1263_v18, %v1207_v22 }
 0x176   : > { %1524 = vrot.lane.b32.xlu1 %v2213_v21, %s1865_s8  ;;  %v1483_v62 = vmul.f32 %v2213_v21, %v2213_v21  ;;  %v1463_v17 = vsel %vm439_vm13, %v2213_v21, 0.0 }
 0x177   : > { %1341 = vrot.lane.b32.xlu0 %v1264_v24, %s1865_s8  ;;  %v1299_v52 = vmul.f32 %v1264_v24, %v1264_v24  ;;  %v1280_v58 = vsel %vm439_vm13, %v1264_v24, 0.0  ;;  %v1464_v21 = vadd.f32 %v1463_v17, %v1462_v9 }
 0x178   : > { %v1281_v6 = vadd.f32 %v1280_v58, %v1279_v61 }
 0x179   : > { %v1310_v63 = vsel %vm439_vm13, %v1299_v52, 0.0 }
 0x17a   : > { %v1448_v27 = vpop.f32.mrf.mxu3  ;;  %v1311_v18 = vadd.f32 %v1310_v63, %v1309_v4 }
 0x17b   : > { %v1416_v26 = vpop.f32.mrf.mxu2 }
 0x17c   : > { %v2218_v28 = vadd.f32 %v1448_v27, %v1416_v26  ;;  %v1209_v29 = vpop.f32.mrf.mxu0  ;;  %v1268_v40 = vpop.f32.mrf.mxu1  ;;  %v1493_v26 = vsel %vm439_vm13, %v1483_v62, 0.0 }
 0x17d   : > { %v1266_v30 = vadd.f32 %v1265_v25, %v1209_v29  ;;  %v1492_v25 = vadd.f32 %v1491_v3, %v1490_v2 }
 0x17e   : > { %1526 = vrot.lane.b32.xlu2 %v2218_v28, %s1865_s8  ;;  %v1484_v13 = vmul.f32 %v2218_v28, %v2218_v28 }
 0x17f   : > { %1343 = vrot.lane.b32.xlu1 %v1266_v30, %s1865_s8  ;;  %v1300_v59 = vmul.f32 %v1266_v30, %v1266_v30  ;;  %v1282_v0 = vsel %vm439_vm13, %v1266_v30, 0.0  ;;  %v1465_v30 = vsel %vm439_vm13, %v2218_v28, 0.0  ;;  %v1494_v42 = vadd.f32 %v1493_v26, %v1492_v25 }
 0x180   : > { %v1283_v19 = vadd.f32 %v1282_v0, %v1281_v6  ;;  %v1495_v35 = vsel %vm439_vm13, %v1484_v13, 0.0  ;;  %v1466_v28 = vadd.f32 %v1465_v30, %v1464_v21 }
 0x181   : > { %v1312_v14 = vsel %vm439_vm13, %v1300_v59, 0.0 }
 0x182   : > { %v1450_v45 = vpop.f32.mrf.mxu3  ;;  %v1313_v33 = vadd.f32 %v1312_v14, %v1311_v18 }
 0x183   : > { %v1418_v41 = vpop.f32.mrf.mxu2 }
 0x184   : > { %v1451_v47 = vadd.f32 %v1450_v45, %v1418_v41  ;;  %v1212_v48 = vpop.f32.mrf.mxu0  ;;  %v1270_v20 = vpop.f32.mrf.mxu1 }
 0x185   : > { %v1269_v53 = vadd.f32 %v1268_v40, %v1212_v48  ;;  %v1496_v48 = vadd.f32 %v1495_v35, %v1494_v42 }
 0x186   : > { %1528 = vrot.lane.b32.xlu0 %v1451_v47, %s1865_s8  ;;  %v1485_v34 = vmul.f32 %v1451_v47, %v1451_v47  ;;  %v1467_v39 = vsel %vm439_vm13, %v1451_v47, 0.0 }
 0x187   : > { %1345 = vrot.lane.b32.xlu2 %v1269_v53, %s1865_s8  ;;  %v1301_v1 = vmul.f32 %v1269_v53, %v1269_v53  ;;  %v1284_v15 = vsel %vm439_vm13, %v1269_v53, 0.0  ;;  %v1468_v49 = vadd.f32 %v1467_v39, %v1466_v28 }
 0x188   : > { %v1285_v31 = vadd.f32 %v1284_v15, %v1283_v19  ;;  %v1497_v44 = vsel %vm439_vm13, %v1485_v34, 0.0 }
 0x189   : > { %v1314_v27 = vsel %vm439_vm13, %v1301_v1, 0.0  ;;  %v1498_v55 = vadd.f32 %v1497_v44, %v1496_v48 }
 0x18a   : > { %v1453_v16 = vpop.f32.mrf.mxu3  ;;  %v1315_v40 = vadd.f32 %v1314_v27, %v1313_v33 }
 0x18b   : > { %v1421_v7 = vpop.f32.mrf.mxu2 }
 0x18c   : > { %v1454_v22 = vadd.f32 %v1453_v16, %v1421_v7  ;;  %v1214_v24 = vpop.f32.mrf.mxu0 }
 0x18d   : > { %v1271_v29 = vadd.f32 %v1270_v20, %v1214_v24 }
 0x18e   : > { %1530 = vrot.lane.b32.xlu1 %v1454_v22, %s1865_s8  ;;  %v1486_v41 = vmul.f32 %v1454_v22, %v1454_v22  ;;  %v1469_v45 = vsel %vm439_vm13, %v1454_v22, 0.0 }
 0x18f   : > { %v1286_v36 = vsel %vm439_vm13, %v1271_v29, 0.0  ;;  %v1302_v37 = vmul.f32 %v1271_v29, %v1271_v29  ;;  %1347 = vrot.lane.b32.xlu0 %v1271_v29, %s1865_s8  ;;  %v1470_v56 = vadd.f32 %v1469_v45, %v1468_v49 }
 0x190   : > { %v1287_v12 = vadd.f32 %v1286_v36, %v1285_v31  ;;  %v1499_v52 = vsel %vm439_vm13, %v1486_v41, 0.0 }
 0x191   : > { %v1316_v43 = vsel %vm439_vm13, %v1302_v37, 0.0  ;;  %v1500_v59 = vadd.f32 %v1499_v52, %v1498_v55 }
 0x192   : > { %v1288_v46 = vrot.slane %v1287_v12, 4  ;;  %v1317_v23 = vadd.f32 %v1316_v43, %v1315_v40  ;;  %v1455_v50 = vpop.f32.mrf.mxu3 }
 0x193   : > { %v1423_v38 = vpop.f32.mrf.mxu2 }
 0x194   : > { %v1289_v47 = vadd.f32 %v1288_v46, %v1287_v12  ;;  %v1318_v53 = vrot.slane %v1317_v23, 4  ;;  %v1456_v54 = vadd.f32 %v1455_v50, %v1423_v38 }
 0x196   : > { %v1290_v57 = vrot.slane %v1289_v47, 2  ;;  %v1319_v51 = vadd.f32 %v1318_v53, %v1317_v23  ;;  %v1471_v8 = vsel %vm439_vm13, %v1456_v54, 0.0  ;;  %v1487_v58 = vmul.f32 %v1456_v54, %v1456_v54  ;;  %1532 = vrot.lane.b32.xlu2 %v1456_v54, %s1865_s8 }
 0x197   : > { %v1472_v32 = vadd.f32 %v1471_v8, %v1470_v56 }
 0x198   : > { %v1291_v5 = vadd.f32 %v1290_v57, %v1289_v47  ;;  %v1320_v60 = vrot.slane %v1319_v51, 2  ;;  %v1501_v61 = vsel %vm439_vm13, %v1487_v58, 0.0 }
 0x199   : > { %v1473_v62 = vrot.slane %v1472_v32, 4  ;;  %v1502_v63 = vadd.f32 %v1501_v61, %v1500_v59 }
 0x19a   : > { %v1321_v0 = vadd.f32 %v1320_v60, %v1319_v51  ;;  %v1292_v3 = vrot.slane %v1291_v5, 1 }
 0x19b   : > { %v1474_v1 = vadd.f32 %v1473_v62, %v1472_v32  ;;  %v1503_v2 = vrot.slane %v1502_v63, 4 }
 0x19c   : > { %v1322_v4 = vrot.slane %v1321_v0, 1  ;;  %v1293_v13 = vadd.f32 %v1292_v3, %v1291_v5 }
 0x19d   : > { %v1475_v6 = vrot.slane %v1474_v1, 2  ;;  %v1504_v7 = vadd.f32 %v1503_v2, %v1502_v63 }
 0x19e   : > { %v1323_v15 = vadd.f32 %v1322_v4, %v1321_v0  ;;  %v1294_v19 = vadd.f32 %v1293_v13, %v2205_v10 }
 0x19f   : > { %v1505_v9 = vrot.slane %v1504_v7, 2  ;;  %v1476_v14 = vadd.f32 %v1475_v6, %v1474_v1 }
 0x1a0   : > { %v1324_v25 = vadd.f32 %v1323_v15, %v2208_v11 }
 0x1a1   : > { %v1506_v16 = vadd.f32 %v1505_v9, %v1504_v7  ;;  %v1477_v17 = vrot.slane %v1476_v14, 1 }
 0x1a3   : > { %v1507_v18 = vrot.slane %v1506_v16, 1  ;;  %v1478_v20 = vadd.f32 %v1477_v17, %v1476_v14 }
 0x1a5   : > { %v1508_v22 = vadd.f32 %v1507_v18, %v1506_v16  ;;  %v1479_v24 = vadd.f32 %v1478_v20, %v1294_v19 }
 0x1a7   : > { %v1550_v26 = vmul.f32 0.00390625, %v1479_v24  ;;  %v1509_v27 = vadd.f32 %v1508_v22, %v1324_v25 }
 0x1a9   : > { %1567 = vrot.lane.b32.xlu0 %v1550_v26, %s1865_s8  ;;  %v1552_v29 = vmul.f32 %v1550_v26, %v1550_v26  ;;  %v1551_v30 = vmul.f32 0.00390625, %v1509_v27 }
 0x1ab   : > { %v1553_v33 = vsub.f32 %v1551_v30, %v1552_v29 }
 0x1ad   : > { %v1554_v34 = vmax.f32 %v1553_v33, 0.0 }
 0x1af   : > { %v1555_v31 = vadd.f32 1e-05, %v1554_v34 }
 0x1b1   : > { %v1334_v21 = vpop.permute.xlu2 %1333  ;;  %1853 = vrsqrt.f32 %v1555_v31  ;;  %vm1562_vm3 = vweird.f32 %v1555_v31 }
 0x1b2   : > { %1358 = vst.msk [vmem:[%s2130_s7] sm:$0xff] %vm1357_vm1, %v1334_v21 }
 0x1b7   : > { %v1854_v10 = vpop.eup %1853 }
 0x1b8   : > { %v1557_v35 = vmul.f32 %v1854_v10, %v1555_v31  ;;  %vm1563_vm2 = vweird.f32 %v1854_v10 }
 0x1b9   : > { %vm1564_vm4 = vmor %vm1562_vm3, %vm1563_vm2  ;;  %v1576_v57 = vld [vmem:[%s2130_s7] sm:$0xff] }
 0x1ba   : > { %v1558_v11 = vmul.f32 %v1854_v10, %v1557_v35 }
 0x1bc   : > { %v1559_v36 = vmul.f32 0.5, %v1558_v11 }
 0x1be   : > { %v1560_v37 = vsub.f32 1.5, %v1559_v36 }
 0x1c0   : > { %v1521_v39 = vpop.permute.xlu2 %1520  ;;  %v1561_v40 = vmul.f32 %v1854_v10, %v1560_v37 }
 0x1c1   : > { %1819 = vst.msk [vmem:[%s2130_s7 + $0x18] sm:$0xff] %vm1357_vm1, %v1521_v39 }
 0x1c2   : > { %v1565_v41 = vsel %vm1564_vm4, %v1854_v10, %v1561_v40 }
 0x1c3   : > { %1572 = vrot.lane.b32.xlu1 %v1565_v41, %s1865_s8 }
 0x1c8   : > { %v1579_v59 = vld [vmem:[%s2130_s7 + $0x18] sm:$0xff] }
 0x1c9   : > { %v1340_v12 = vpop.permute.xlu2 %1339 }
 0x1ca   : > { %1361 = vst.msk [vmem:[%s2130_s7 + $0x30] sm:$0xff] %vm1357_vm1, %v1340_v12 }
 0x1d0   : > { %v1519_v42 = vpop.permute.xlu1 %1518 }
 0x1d1   : > { %1818 = vst.msk [vmem:[%s2130_s7 + $0x8] sm:$0xff] %vm1357_vm1, %v1519_v42  ;;  %v1336_v28 = vpop.permute.xlu0 %1335  ;;  %v1582_v6 = vld [vmem:[%s2130_s7 + $0x30] sm:$0xff] }
 0x1d2   : > { %1359 = vst.msk [vmem:[%s2130_s7 + $0x10] sm:$0xff] %vm1357_vm1, %v1336_v28 }
 0x1d8   : > { %v1527_v43 = vpop.permute.xlu2 %1526  ;;  %v1577_v51 = vld [vmem:[%s2130_s7 + $0x8] sm:$0xff] }
 0x1d9   : > { %1822 = vst.msk [vmem:[%s2130_s7 + $0x48] sm:$0xff] %vm1357_vm1, %v1527_v43  ;;  %v1338_v44 = vpop.permute.xlu1 %1337  ;;  %v1578_v8 = vld [vmem:[%s2130_s7 + $0x10] sm:$0xff] }
 0x1da   : > { %1360 = vst.msk [vmem:[%s2130_s7 + $0x20] sm:$0xff] %vm1357_vm1, %v1338_v44 }
 0x1e0   : > { %v1523_v45 = vpop.permute.xlu0 %1522  ;;  %v1585_v20 = vld [vmem:[%s2130_s7 + $0x48] sm:$0xff] }
 0x1e1   : > { %1820 = vst.msk [vmem:[%s2130_s7 + $0x28] sm:$0xff] %vm1357_vm1, %v1523_v45  ;;  %v1346_v46 = vpop.permute.xlu2 %1345  ;;  %v1580_v62 = vld [vmem:[%s2130_s7 + $0x20] sm:$0xff] }
 0x1e2   : > { %1364 = vst.msk [vmem:[%s2130_s7 + $0x60] sm:$0xff] %vm1357_vm1, %v1346_v46 }
 0x1e8   : > { %v1525_v23 = vpop.permute.xlu1 %1524  ;;  %v1581_v0 = vld [vmem:[%s2130_s7 + $0x28] sm:$0xff] }
 0x1e9   : > { %1821 = vst.msk [vmem:[%s2130_s7 + $0x38] sm:$0xff] %vm1357_vm1, %v1525_v23  ;;  %v1342_v38 = vpop.permute.xlu0 %1341  ;;  %v1588_v35 = vld [vmem:[%s2130_s7 + $0x60] sm:$0xff] }
 0x1ea   : > { %1362 = vst.msk [vmem:[%s2130_s7 + $0x40] sm:$0xff] %vm1357_vm1, %v1342_v38 }
 0x1f0   : > { %v1533_v48 = vpop.permute.xlu2 %1532  ;;  %v1583_v13 = vld [vmem:[%s2130_s7 + $0x38] sm:$0xff] }
 0x1f1   : > { %1825 = vst.msk [vmem:[%s2130_s7 + $0x78] sm:$0xff] %vm1357_vm1, %v1533_v48  ;;  %v1344_v49 = vpop.permute.xlu1 %1343  ;;  %v1584_v14 = vld [vmem:[%s2130_s7 + $0x40] sm:$0xff] }
 0x1f2   : > { %1363 = vst.msk [vmem:[%s2130_s7 + $0x50] sm:$0xff] %vm1357_vm1, %v1344_v49 }
 0x1f8   : > { %v1529_v50 = vpop.permute.xlu0 %1528  ;;  %v1591_v45 = vld [vmem:[%s2130_s7 + $0x78] sm:$0xff] }
 0x1f9   : > { %1823 = vst.msk [vmem:[%s2130_s7 + $0x58] sm:$0xff] %vm1357_vm1, %v1529_v50  ;;  %v1586_v27 = vld [vmem:[%s2130_s7 + $0x50] sm:$0xff] }
 0x200   : > { %v1531_v52 = vpop.permute.xlu1 %1530  ;;  %v1587_v34 = vld [vmem:[%s2130_s7 + $0x58] sm:$0xff] }
 0x201   : > { %1824 = vst.msk [vmem:[%s2130_s7 + $0x68] sm:$0xff] %vm1357_vm1, %v1531_v52  ;;  %v1348_v47 = vpop.permute.xlu0 %1347 }
 0x202   : > { %1365 = vst.msk [vmem:[%s2130_s7 + $0x70] sm:$0xff] %vm1357_vm1, %v1348_v47 }
 0x208   : > { %v1589_v39 = vld [vmem:[%s2130_s7 + $0x68] sm:$0xff] }
 0x209   : > { %v1590_v42 = vld [vmem:[%s2130_s7 + $0x70] sm:$0xff] }
 0x21b   : > { %v1568_v53 = vpop.permute.xlu0 %1567 }
 0x21c   : > { %v1570_v54 = vsel %vm439_vm13, %v1550_v26, %v1568_v53 }
 0x21d   : > { %v2309_v55 = vperm.slane %v1570_v54, 0 }
 0x21f   : > { %v1593_v32 = vsub.f32 %v1576_v57, %v2309_v55  ;;  %v1594_v5 = vsub.f32 %v1577_v51, %v2309_v55  ;;  %v1595_v60 = vsub.f32 %v1578_v8, %v2309_v55  ;;  %v1596_v63 = vsub.f32 %v1579_v59, %v2309_v55 }
 0x220   : > { %v1597_v1 = vsub.f32 %v1580_v62, %v2309_v55  ;;  %v1598_v7 = vsub.f32 %v1581_v0, %v2309_v55  ;;  %v1599_v15 = vsub.f32 %v1582_v6, %v2309_v55  ;;  %v1600_v17 = vsub.f32 %v1583_v13, %v2309_v55 }
 0x221   : > { %v1601_v18 = vsub.f32 %v1584_v14, %v2309_v55  ;;  %v1602_v29 = vsub.f32 %v1585_v20, %v2309_v55  ;;  %v1603_v31 = vsub.f32 %v1586_v27, %v2309_v55  ;;  %v1604_v11 = vsub.f32 %v1587_v34, %v2309_v55 }
 0x222   : > { %v1605_v40 = vsub.f32 %v1588_v35, %v2309_v55  ;;  %v1606_v28 = vsub.f32 %v1589_v39, %v2309_v55  ;;  %v1607_v46 = vsub.f32 %v1590_v42, %v2309_v55  ;;  %v1608_v48 = vsub.f32 %v1591_v45, %v2309_v55 }
 0x235   : > { %v1573_v56 = vpop.permute.xlu1 %1572 }
 0x236   : > { %v1575_v58 = vsel %vm439_vm13, %v1565_v41, %v1573_v56 }
 0x237   : > { %v1609_v61 = vperm.slane %v1575_v58, 0 }
 0x239   : > { %v1610_v2 = vmul.f32 %v1609_v61, %v1593_v32  ;;  %v1611_v3 = vmul.f32 %v1609_v61, %v1594_v5  ;;  %v1612_v4 = vmul.f32 %v1609_v61, %v1595_v60  ;;  %v1613_v9 = vmul.f32 %v1609_v61, %v1596_v63 }
 0x23a   : > { %v1614_v16 = vmul.f32 %v1609_v61, %v1597_v1  ;;  %v1615_v19 = vmul.f32 %v1609_v61, %v1598_v7  ;;  %v1616_v22 = vmul.f32 %v1609_v61, %v1599_v15  ;;  %v1617_v30 = vmul.f32 %v1609_v61, %v1600_v17 }
 0x23b   : > { %v1626_v24 = vmax.f32 %v1610_v2, 0.0  ;;  %v1627_v25 = vmax.f32 %v1611_v3, 0.0  ;;  %v1628_v26 = vmax.f32 %v1612_v4, 0.0  ;;  %v1629_v33 = vmax.f32 %v1613_v9, 0.0 }
 0x23c   : > { %v1618_v21 = vmul.f32 %v1609_v61, %v1601_v18  ;;  %v1630_v10 = vmax.f32 %v1614_v16, 0.0  ;;  %v1619_v36 = vmul.f32 %v1609_v61, %v1602_v29  ;;  %v1631_v37 = vmax.f32 %v1615_v19, 0.0 }
 0x23d   : > { %1643 = vst.msk [vmem:[%s2130_s7] sm:$0xff] %vm1642_vm5, %v1626_v24  ;;  %v1620_v41 = vmul.f32 %v1609_v61, %v1603_v31  ;;  %v1632_v12 = vmax.f32 %v1616_v22, 0.0  ;;  %v1621_v43 = vmul.f32 %v1609_v61, %v1604_v11  ;;  %v1633_v44 = vmax.f32 %v1617_v30, 0.0 }
 0x23e   : > { %1644 = vst.msk [vmem:[%s2130_s7 + $0x8] sm:$0xff] %vm1642_vm5, %v1627_v25  ;;  %v1622_v23 = vmul.f32 %v1609_v61, %v1605_v40  ;;  %v1634_v38 = vmax.f32 %v1618_v21, 0.0  ;;  %v1623_v49 = vmul.f32 %v1609_v61, %v1606_v28  ;;  %v1635_v50 = vmax.f32 %v1619_v36, 0.0 }
 0x23f   : > { %1645 = vst.msk [vmem:[%s2130_s7 + $0x10] sm:$0xff] %vm1642_vm5, %v1628_v26  ;;  %v1624_v52 = vmul.f32 %v1609_v61, %v1607_v46  ;;  %v1636_v47 = vmax.f32 %v1620_v41, 0.0  ;;  %v1625_v53 = vmul.f32 %v1609_v61, %v1608_v48  ;;  %v1637_v54 = vmax.f32 %v1621_v43, 0.0 }
 0x240   : > { %1646 = vst.msk [vmem:[%s2130_s7 + $0x18] sm:$0xff] %vm1642_vm5, %v1629_v33  ;;  %v1638_v56 = vmax.f32 %v1622_v23, 0.0  ;;  %v1639_v55 = vmax.f32 %v1623_v49, 0.0 }
 0x241   : > { %1647 = vst.msk [vmem:[%s2130_s7 + $0x20] sm:$0xff] %vm1642_vm5, %v1630_v10  ;;  %v1640_v57 = vmax.f32 %v1624_v52, 0.0  ;;  %v1641_v51 = vmax.f32 %v1625_v53, 0.0 }
 0x242   : > { %1648 = vst.msk [vmem:[%s2130_s7 + $0x28] sm:$0xff] %vm1642_vm5, %v1631_v37 }
 0x243   : > { %1649 = vst.msk [vmem:[%s2130_s7 + $0x30] sm:$0xff] %vm1642_vm5, %v1632_v12 }
 0x244   : > { %1650 = vst.msk [vmem:[%s2130_s7 + $0x38] sm:$0xff] %vm1642_vm5, %v1633_v44 }
 0x245   : > { %1651 = vst.msk [vmem:[%s2130_s7 + $0x40] sm:$0xff] %vm1642_vm5, %v1634_v38 }
 0x246   : > { %1652 = vst.msk [vmem:[%s2130_s7 + $0x48] sm:$0xff] %vm1642_vm5, %v1635_v50 }
 0x247   : > { %1653 = vst.msk [vmem:[%s2130_s7 + $0x50] sm:$0xff] %vm1642_vm5, %v1636_v47 }
 0x248   : > { %1654 = vst.msk [vmem:[%s2130_s7 + $0x58] sm:$0xff] %vm1642_vm5, %v1637_v54 }
 0x249   : > { %1655 = vst.msk [vmem:[%s2130_s7 + $0x60] sm:$0xff] %vm1642_vm5, %v1638_v56 }
 0x24a   : > { %1656 = vst.msk [vmem:[%s2130_s7 + $0x68] sm:$0xff] %vm1642_vm5, %v1639_v55 }
 0x24b   : > { %1657 = vst.msk [vmem:[%s2130_s7 + $0x70] sm:$0xff] %vm1642_vm5, %v1640_v57 }
 0x24c   : > { %1658 = vst.msk [vmem:[%s2130_s7 + $0x78] sm:$0xff] %vm1642_vm5, %v1641_v51 }
 0x24d PF: > { %s12_s9 = sadd.s32 1, %s1861_s9  }
 0x24e   : > { %p9_p4 = scmp.ge.s32.totalorder %s12_s9, 4  }
 0x250   :  { %11 = sbr.rel (!%p9_p4) target bundleno = 1 (0x1), region = 69 }

</bundles_post_ra>
